<compile_context>
chip_gen: v6e
topology: v6e:2x2x1
jax: 0.10.0
libtpu: 0.0.40
codegen_flags: <defaults>
</compile_context>

<pallas_src>
import functools

import jax
import jax.numpy as jnp
from jax.experimental import pallas as pl
from jax.experimental.pallas import tpu as pltpu


# Max pixels per block on the 128-lane axis.  16384 keeps double-buffered
# logits blocks plus elementwise intermediates well inside every generation's
# VMEM budget (v5e 16 MiB scoped default, v7x 64 MiB physical).
_TILE_LANES_CAP = 16384
_VMEM_LIMIT_BYTES = 48 * 1024 * 1024  # safe on v7x (64 MiB phys), generous on v5e/v6e


def _cdiv(a, b):
    return -(-a // b)


def _round_up(x, m):
    return _cdiv(x, m) * m


def _choose_tile(n, hw):
    """Pick (lane tile, num blocks) for the pixel axis."""
    hw128 = _round_up(hw, 128)
    tl = min(_TILE_LANES_CAP, hw128)
    nb = _cdiv(hw128, tl)
    # v7x has 2 TensorCores: make sure the "parallel" grid has >= 2 steps when
    # the problem allows it, so small per-scale calls don't idle a core.
    if n * nb < 2 and hw128 >= 256:
        tl = _round_up(_cdiv(hw128, 2), 128)
        nb = _cdiv(hw128, tl)
    return tl, nb


# ---------------------------------------------------------------------------
# Pallas kernel: per-block masked cross-entropy partial sum + valid-pixel count
# ---------------------------------------------------------------------------
def _ce_kernel(labels_ref, logits_ref, loss_ref, cnt_ref, *, ignore_index, hw):
    # Blocks:
    #   labels_ref : (1, 1, TL)  int32      -- pixels on the lane axis
    #   logits_ref : (1, C, TL)  f32/bf16   -- classes on the sublane axis
    #   loss_ref   : (1, 1, 8, 128) f32     -- per-block partial (scalar broadcast)
    #   cnt_ref    : (1, 1, 8, 128) f32
    tl = labels_ref.shape[-1]
    logits = logits_ref[0].astype(jnp.float32)   # (C, TL), compute in f32
    labels = labels_ref[0]                       # (1, TL) int32

    # In-bounds mask: lanes past the true pixel count (partial final block, no
    # HBM pad copy of the logits) contribute nothing.
    lane = jax.lax.broadcasted_iota(jnp.int32, labels.shape, 1)      # (1, TL)
    in_bounds = (pl.program_id(1) * tl + lane) < hw                  # (1, TL)

    # log-sum-exp over the class (sublane) axis -- cheap XLU reduces.
    m = jnp.max(logits, axis=0, keepdims=True)                              # (1, TL)
    lse = m + jnp.log(jnp.sum(jnp.exp(logits - m), axis=0, keepdims=True))  # (1, TL)

    # target-class logit via sublane-iota compare (one-hot-free select)
    cls = jax.lax.broadcasted_iota(jnp.int32, logits.shape, 0)              # (C, TL)
    tgt = jnp.sum(jnp.where(cls == labels, logits, 0.0), axis=0, keepdims=True)

    valid = (labels != ignore_index) & in_bounds                            # (1, TL)
    per_pixel = jnp.where(valid, lse - tgt, 0.0)                            # (1, TL)

    loss_part = jnp.sum(per_pixel)
    cnt_part = jnp.sum(valid.astype(jnp.float32))

    # One scalar per block, broadcast into a lane/sublane-aligned (8,128) output
    # block so the store is unmasked and the grid stays fully "parallel".
    loss_ref[...] = jnp.full(loss_ref.shape, loss_part, dtype=jnp.float32)
    cnt_ref[...] = jnp.full(cnt_ref.shape, cnt_part, dtype=jnp.float32)


def masked_cross_entropy(logits_nchw, labels_nhw, ignore_index):
    """F.cross_entropy(logits, labels, ignore_index=..., reduction='mean')."""
    N, C, H, W = logits_nchw.shape
    HW = H * W

    tl, nb = _choose_tile(N, HW)

    logits = logits_nchw.reshape(N, C, HW)          # contiguous reshape: free
    labels = labels_nhw.reshape(N, 1, HW).astype(jnp.int32)

    # Only tiny images (HW smaller than one lane tile) ever get padded; large
    # non-128-multiple images rely on Pallas partial final blocks plus the
    # in-kernel lane mask instead of a full HBM pad copy of the logits.
    if tl > HW:
        pad = tl - HW
        logits = jnp.pad(logits, ((0, 0), (0, 0), (0, pad)))
        labels = jnp.pad(labels, ((0, 0), (0, 0), (0, pad)),
                         constant_values=ignore_index)

    pixels = N * HW
    itemsize = jnp.dtype(logits.dtype).itemsize
    cost = pl.CostEstimate(
        flops=int(8 * C * pixels),
        transcendentals=int((C + 1) * pixels),
        bytes_accessed=int(pixels * (C * itemsize + 4) + N * nb * 2 * 8 * 128 * 4),
    )

    loss_parts, cnt_parts = pl.pallas_call(
        functools.partial(_ce_kernel, ignore_index=ignore_index, hw=HW),
        out_shape=(
            jax.ShapeDtypeStruct((N, nb, 8, 128), jnp.float32),
            jax.ShapeDtypeStruct((N, nb, 8, 128), jnp.float32),
        ),
        grid=(N, nb),
        in_specs=[
            pl.BlockSpec((1, 1, tl), lambda n, t: (n, 0, t)),
            pl.BlockSpec((1, C, tl), lambda n, t: (n, 0, t)),
        ],
        out_specs=(
            pl.BlockSpec((1, 1, 8, 128), lambda n, t: (n, t, 0, 0)),
            pl.BlockSpec((1, 1, 8, 128), lambda n, t: (n, t, 0, 0)),
        ),
        compiler_params=pltpu.CompilerParams(
            dimension_semantics=("parallel", "parallel"),
            vmem_limit_bytes=_VMEM_LIMIT_BYTES,
        ),
        cost_estimate=cost,
    )(labels, logits)

    loss_sum = jnp.sum(loss_parts[:, :, 0, 0])
    cnt = jnp.sum(cnt_parts[:, :, 0, 0])
    # PyTorch 'mean' divides by the number of non-ignored targets
    # (nan if every pixel is ignored, matching PyTorch).
    return loss_sum / cnt


# ---------------------------------------------------------------------------
# JAX glue: PyTorch-compatible resizes (matmul form, fused by jit around
# pyramid_loss)
# ---------------------------------------------------------------------------
def _interp_matrix(in_size, out_size):
    """Dense 2-tap bilinear interpolation matrix (out_size, in_size),
    matching F.interpolate(..., mode='bilinear', align_corners=False)."""
    scale = in_size / out_size
    coords = (jnp.arange(out_size, dtype=jnp.float32) + 0.5) * scale - 0.5
    coords = jnp.maximum(coords, 0.0)
    i0 = jnp.clip(jnp.floor(coords).astype(jnp.int32), 0, in_size - 1)
    i1 = jnp.minimum(i0 + 1, in_size - 1)
    w1 = coords - i0.astype(jnp.float32)
    w0 = 1.0 - w1
    cols = jnp.arange(in_size, dtype=jnp.int32)[None, :]
    mat = (w0[:, None] * (cols == i0[:, None]).astype(jnp.float32)
           + w1[:, None] * (cols == i1[:, None]).astype(jnp.float32))
    return mat


def bilinear_resize_nchw(x, out_h, out_w, out_dtype=jnp.bfloat16):
    """Separable matmul form of F.interpolate(x, size, mode='bilinear'):
    streams the source once through the MXU (no gather intermediates) and
    emits bf16 so the downstream CE kernel DMAs half the bytes."""
    _, _, H, W = x.shape
    wy = _interp_matrix(H, out_h)            # (out_h, H)
    wx = _interp_matrix(W, out_w)            # (out_w, W)
    tmp = jnp.einsum("oh,nchw->ncow", wy, x, preferred_element_type=jnp.float32)
    out = jnp.einsum("ncow,pw->ncop", tmp, wx, preferred_element_type=jnp.float32)
    return out.astype(out_dtype)


def nearest_resize_nchw(x, out_h, out_w):
    """F.interpolate(x, size=(out_h,out_w), mode='nearest') with exact integer
    index math (matches PyTorch floor semantics bit-exactly)."""
    _, _, H, W = x.shape
    ys = (jnp.arange(out_h) * H) // out_h
    xs = (jnp.arange(out_w) * W) // out_w
    return x[:, :, ys, :][:, :, :, xs]


# ---------------------------------------------------------------------------
# PyramidLoss forward
# ---------------------------------------------------------------------------
@functools.partial(jax.jit, static_argnames=("num_classes", "ignore_index", "scales"))
def pyramid_loss(
    logits_4d,
    labels_3d,
    num_classes=21,
    ignore_index=255,
    scales=(0.25, 0.5, 0.75, 1.0),
):
    N, C, H, W = logits_4d.shape
    # Full-res term: logits stay in the caller's dtype (no .astype round trip).
    total_loss = masked_cross_entropy(logits_4d, labels_3d, ignore_index)
    labels_4d = labels_3d[:, None, :, :]
    for scale in scales:
        if scale == 1.0:
            continue
        assert scale <= 1.0
        now_h, now_w = int(scale * H), int(scale * W)
        now_logits = bilinear_resize_nchw(logits_4d, now_h, now_w)
        now_labels = nearest_resize_nchw(labels_4d, now_h, now_w)[:, 0]
        total_loss = total_loss + masked_cross_entropy(
            now_logits, now_labels, ignore_index
        )
    return total_loss / len(scales)


if __name__ == "__main__":
    num_classes = 21
    ignore_index = 255
    N, H, W = 2, 16, 16

    key = jax.random.PRNGKey(0)
    k_logits, k_labels, k_mask = jax.random.split(key, 3)

    logits = jax.random.normal(k_logits, (N, num_classes, H, W), dtype=jnp.float32)
    labels = jax.random.randint(k_labels, (N, H, W), 0, num_classes, dtype=jnp.int32)
    # sprinkle some ignored pixels
    ignore_mask = jax.random.uniform(k_mask, (N, H, W)) < 0.1
    labels = jnp.where(ignore_mask, ignore_index, labels)

    loss = pyramid_loss(
        logits, labels, num_classes=num_classes, ignore_index=ignore_index
    )
    jax.block_until_ready(loss)
    print("KERNEL_OK")
</pallas_src>

<mosaic_0001>
module attributes {stable_mosaic.version = 11 : i64} {
  func.func @_ce_kernel(%arg0: i32, %arg1: i32, %arg2: memref<1x1x128xi32, #tpu.memory_space<vmem>>, %arg3: memref<1x21x128xbf16, #tpu.memory_space<vmem>>, %arg4: memref<1x1x8x128xf32, #tpu.memory_space<vmem>>, %arg5: memref<1x1x8x128xf32, #tpu.memory_space<vmem>>) attributes {dimension_semantics = [#tpu.dimension_semantics<parallel>, #tpu.dimension_semantics<parallel>], iteration_bounds = array<i64: 2, 1>, scalar_prefetch = 0 : i64, scratch_operands = 0 : i64, tpu.core_type = #tpu.core_type<tc>, window_params = [{transform_indices = @transform_0, window_bounds = array<i64: 1, 1, 128>}, {transform_indices = @transform_1, window_bounds = array<i64: 1, 21, 128>}, {transform_indices = @transform_2, window_bounds = array<i64: 1, 1, 8, 128>}, {transform_indices = @transform_3, window_bounds = array<i64: 1, 1, 8, 128>}]} {
    %c0 = arith.constant 0 : index
    %c0_0 = arith.constant 0 : index
    %c0_1 = arith.constant 0 : index
    %0 = vector.load %arg3[%c0, %c0_0, %c0_1] : memref<1x21x128xbf16, #tpu.memory_space<vmem>>, vector<1x21x128xbf16>
    %1 = vector.shape_cast %0 : vector<1x21x128xbf16> to vector<21x128xbf16>
    %2 = arith.extf %1 : vector<21x128xbf16> to vector<21x128xf32>
    %c0_2 = arith.constant 0 : index
    %c0_3 = arith.constant 0 : index
    %c0_4 = arith.constant 0 : index
    %3 = vector.load %arg2[%c0_2, %c0_3, %c0_4] : memref<1x1x128xi32, #tpu.memory_space<vmem>>, vector<1x1x128xi32>
    %4 = vector.shape_cast %3 : vector<1x1x128xi32> to vector<1x128xi32>
    %5 = tpu.iota {dimensions = array<i32: 1>} : vector<1x128xi32>
    %c128_i32 = arith.constant 128 : i32
    %6 = arith.muli %arg1, %c128_i32 : i32
    %7 = vector.broadcast %6 : i32 to vector<1x128xi32>
    %8 = arith.addi %7, %5 : vector<1x128xi32>
    %c16_i32 = arith.constant 16 : i32
    %9 = vector.broadcast %c16_i32 : i32 to vector<1x128xi32>
    %10 = arith.cmpi slt, %8, %9 : vector<1x128xi32>
    %cst = arith.constant dense<0xFF800000> : vector<128xf32>
    %11 = vector.multi_reduction <maximumf>, %2, %cst [0] : vector<21x128xf32> to vector<128xf32>
    %12 = vector.shape_cast %11 : vector<128xf32> to vector<1x128xf32>
    %13 = vector.broadcast %12 : vector<1x128xf32> to vector<21x128xf32>
    %14 = arith.subf %2, %13 : vector<21x128xf32>
    %15 = math.exp %14 : vector<21x128xf32>
    %cst_5 = arith.constant dense<0.000000e+00> : vector<128xf32>
    %16 = vector.multi_reduction <add>, %15, %cst_5 [0] : vector<21x128xf32> to vector<128xf32>
    %17 = vector.shape_cast %16 : vector<128xf32> to vector<1x128xf32>
    %18 = math.log %17 : vector<1x128xf32>
    %19 = arith.addf %12, %18 : vector<1x128xf32>
    %20 = tpu.iota {dimensions = array<i32: 0>} : vector<21x128xi32>
    %21 = vector.broadcast %4 : vector<1x128xi32> to vector<21x128xi32>
    %22 = arith.cmpi eq, %20, %21 : vector<21x128xi32>
    %cst_6 = arith.constant 0.000000e+00 : f32
    %23 = vector.broadcast %cst_6 : f32 to vector<21x128xf32>
    %24 = arith.select %22, %2, %23 : vector<21x128xi1>, vector<21x128xf32>
    %cst_7 = arith.constant dense<0.000000e+00> : vector<128xf32>
    %25 = vector.multi_reduction <add>, %24, %cst_7 [0] : vector<21x128xf32> to vector<128xf32>
    %26 = vector.shape_cast %25 : vector<128xf32> to vector<1x128xf32>
    %c255_i32 = arith.constant 255 : i32
    %27 = vector.broadcast %c255_i32 : i32 to vector<1x128xi32>
    %28 = arith.cmpi ne, %4, %27 : vector<1x128xi32>
    %29 = arith.andi %28, %10 : vector<1x128xi1>
    %30 = arith.subf %19, %26 : vector<1x128xf32>
    %cst_8 = arith.constant 0.000000e+00 : f32
    %31 = vector.broadcast %cst_8 : f32 to vector<1x128xf32>
    %32 = arith.select %29, %30, %31 : vector<1x128xi1>, vector<1x128xf32>
    %33 = vector.shape_cast %32 : vector<1x128xf32> to vector<1x1x128xf32>
    %cst_9 = arith.constant dense<0.000000e+00> : vector<1xf32>
    %34 = vector.multi_reduction <add>, %33, %cst_9 [1, 2] : vector<1x1x128xf32> to vector<1xf32>
    %35 = vector.shape_cast %34 : vector<1xf32> to vector<1x1x1xf32>
    %36 = vector.extract %35[0, 0, 0] : f32 from vector<1x1x1xf32>
    %37 = arith.extui %29 : vector<1x128xi1> to vector<1x128xi32>
    %38 = arith.sitofp %37 : vector<1x128xi32> to vector<1x128xf32>
    %39 = vector.shape_cast %38 : vector<1x128xf32> to vector<1x1x128xf32>
    %cst_10 = arith.constant dense<0.000000e+00> : vector<1xf32>
    %40 = vector.multi_reduction <add>, %39, %cst_10 [1, 2] : vector<1x1x128xf32> to vector<1xf32>
    %41 = vector.shape_cast %40 : vector<1xf32> to vector<1x1x1xf32>
    %42 = vector.extract %41[0, 0, 0] : f32 from vector<1x1x1xf32>
    %43 = vector.broadcast %36 : f32 to vector<1x1x8x128xf32>
    %c0_11 = arith.constant 0 : index
    %c0_12 = arith.constant 0 : index
    %c0_13 = arith.constant 0 : index
    %c0_14 = arith.constant 0 : index
    %44 = vector.load %arg4[%c0_11, %c0_12, %c0_13, %c0_14] : memref<1x1x8x128xf32, #tpu.memory_space<vmem>>, vector<1x1x8x128xf32>
    tpu.vector_store %arg4[%c0_11, %c0_12, %c0_13, %c0_14], %43 {strides = array<i32>} : memref<1x1x8x128xf32, #tpu.memory_space<vmem>>, vector<1x1x8x128xf32>,
    %45 = vector.broadcast %42 : f32 to vector<1x1x8x128xf32>
    %c0_15 = arith.constant 0 : index
    %c0_16 = arith.constant 0 : index
    %c0_17 = arith.constant 0 : index
    %c0_18 = arith.constant 0 : index
    %46 = vector.load %arg5[%c0_15, %c0_16, %c0_17, %c0_18] : memref<1x1x8x128xf32, #tpu.memory_space<vmem>>, vector<1x1x8x128xf32>
    tpu.vector_store %arg5[%c0_15, %c0_16, %c0_17, %c0_18], %45 {strides = array<i32>} : memref<1x1x8x128xf32, #tpu.memory_space<vmem>>, vector<1x1x8x128xf32>,
    return
  }
  func.func @transform_0(%arg0: i32, %arg1: i32) -> (i32, i32, i32) {
    %c0_i32 = arith.constant 0 : i32
    %c0_i32_0 = arith.constant 0 : i32
    return %arg0, %c0_i32, %arg1 : i32, i32, i32
  }
  func.func @transform_1(%arg0: i32, %arg1: i32) -> (i32, i32, i32) {
    %c0_i32 = arith.constant 0 : i32
    %c0_i32_0 = arith.constant 0 : i32
    return %arg0, %c0_i32, %arg1 : i32, i32, i32
  }
  func.func @transform_2(%arg0: i32, %arg1: i32) -> (i32, i32, i32, i32) {
    %c0_i32 = arith.constant 0 : i32
    %c0_i32_0 = arith.constant 0 : i32
    %c0_i32_1 = arith.constant 0 : i32
    return %arg0, %arg1, %c0_i32, %c0_i32_0 : i32, i32, i32, i32
  }
  func.func @transform_3(%arg0: i32, %arg1: i32) -> (i32, i32, i32, i32) {
    %c0_i32 = arith.constant 0 : i32
    %c0_i32_0 = arith.constant 0 : i32
    %c0_i32_1 = arith.constant 0 : i32
    return %arg0, %arg1, %c0_i32, %c0_i32_0 : i32, i32, i32, i32
  }
}

module attributes {stable_mosaic.version = 11 : i64} {
  func.func @_ce_kernel(%arg0: i32, %arg1: i32, %arg2: memref<1x1x256xi32, #tpu.memory_space<vmem>>, %arg3: memref<1x21x256xf32, #tpu.memory_space<vmem>>, %arg4: memref<1x1x8x128xf32, #tpu.memory_space<vmem>>, %arg5: memref<1x1x8x128xf32, #tpu.memory_space<vmem>>) attributes {dimension_semantics = [#tpu.dimension_semantics<parallel>, #tpu.dimension_semantics<parallel>], iteration_bounds = array<i64: 2, 1>, scalar_prefetch = 0 : i64, scratch_operands = 0 : i64, tpu.core_type = #tpu.core_type<tc>, window_params = [{transform_indices = @transform_0, window_bounds = array<i64: 1, 1, 256>}, {transform_indices = @transform_1, window_bounds = array<i64: 1, 21, 256>}, {transform_indices = @transform_2, window_bounds = array<i64: 1, 1, 8, 128>}, {transform_indices = @transform_3, window_bounds = array<i64: 1, 1, 8, 128>}]} {
    %c0 = arith.constant 0 : index
    %c0_0 = arith.constant 0 : index
    %c0_1 = arith.constant 0 : index
    %0 = vector.load %arg3[%c0, %c0_0, %c0_1] : memref<1x21x256xf32, #tpu.memory_space<vmem>>, vector<1x21x256xf32>
    %1 = vector.shape_cast %0 : vector<1x21x256xf32> to vector<21x256xf32>
    %c0_2 = arith.constant 0 : index
    %c0_3 = arith.constant 0 : index
    %c0_4 = arith.constant 0 : index
    %2 = vector.load %arg2[%c0_2, %c0_3, %c0_4] : memref<1x1x256xi32, #tpu.memory_space<vmem>>, vector<1x1x256xi32>
    %3 = vector.shape_cast %2 : vector<1x1x256xi32> to vector<1x256xi32>
    %4 = tpu.iota {dimensions = array<i32: 1>} : vector<1x256xi32>
    %c256_i32 = arith.constant 256 : i32
    %5 = arith.muli %arg1, %c256_i32 : i32
    %6 = vector.broadcast %5 : i32 to vector<1x256xi32>
    %7 = arith.addi %6, %4 : vector<1x256xi32>
    %c256_i32_5 = arith.constant 256 : i32
    %8 = vector.broadcast %c256_i32_5 : i32 to vector<1x256xi32>
    %9 = arith.cmpi slt, %7, %8 : vector<1x256xi32>
    %cst = arith.constant dense<0xFF800000> : vector<256xf32>
    %10 = vector.multi_reduction <maximumf>, %1, %cst [0] : vector<21x256xf32> to vector<256xf32>
    %11 = vector.shape_cast %10 : vector<256xf32> to vector<1x256xf32>
    %12 = vector.broadcast %11 : vector<1x256xf32> to vector<21x256xf32>
    %13 = arith.subf %1, %12 : vector<21x256xf32>
    %14 = math.exp %13 : vector<21x256xf32>
    %cst_6 = arith.constant dense<0.000000e+00> : vector<256xf32>
    %15 = vector.multi_reduction <add>, %14, %cst_6 [0] : vector<21x256xf32> to vector<256xf32>
    %16 = vector.shape_cast %15 : vector<256xf32> to vector<1x256xf32>
    %17 = math.log %16 : vector<1x256xf32>
    %18 = arith.addf %11, %17 : vector<1x256xf32>
    %19 = tpu.iota {dimensions = array<i32: 0>} : vector<21x256xi32>
    %20 = vector.broadcast %3 : vector<1x256xi32> to vector<21x256xi32>
    %21 = arith.cmpi eq, %19, %20 : vector<21x256xi32>
    %cst_7 = arith.constant 0.000000e+00 : f32
    %22 = vector.broadcast %cst_7 : f32 to vector<21x256xf32>
    %23 = arith.select %21, %1, %22 : vector<21x256xi1>, vector<21x256xf32>
    %cst_8 = arith.constant dense<0.000000e+00> : vector<256xf32>
    %24 = vector.multi_reduction <add>, %23, %cst_8 [0] : vector<21x256xf32> to vector<256xf32>
    %25 = vector.shape_cast %24 : vector<256xf32> to vector<1x256xf32>
    %c255_i32 = arith.constant 255 : i32
    %26 = vector.broadcast %c255_i32 : i32 to vector<1x256xi32>
    %27 = arith.cmpi ne, %3, %26 : vector<1x256xi32>
    %28 = arith.andi %27, %9 : vector<1x256xi1>
    %29 = arith.subf %18, %25 : vector<1x256xf32>
    %cst_9 = arith.constant 0.000000e+00 : f32
    %30 = vector.broadcast %cst_9 : f32 to vector<1x256xf32>
    %31 = arith.select %28, %29, %30 : vector<1x256xi1>, vector<1x256xf32>
    %32 = vector.shape_cast %31 : vector<1x256xf32> to vector<1x1x256xf32>
    %cst_10 = arith.constant dense<0.000000e+00> : vector<1xf32>
    %33 = vector.multi_reduction <add>, %32, %cst_10 [1, 2] : vector<1x1x256xf32> to vector<1xf32>
    %34 = vector.shape_cast %33 : vector<1xf32> to vector<1x1x1xf32>
    %35 = vector.extract %34[0, 0, 0] : f32 from vector<1x1x1xf32>
    %36 = arith.extui %28 : vector<1x256xi1> to vector<1x256xi32>
    %37 = arith.sitofp %36 : vector<1x256xi32> to vector<1x256xf32>
    %38 = vector.shape_cast %37 : vector<1x256xf32> to vector<1x1x256xf32>
    %cst_11 = arith.constant dense<0.000000e+00> : vector<1xf32>
    %39 = vector.multi_reduction <add>, %38, %cst_11 [1, 2] : vector<1x1x256xf32> to vector<1xf32>
    %40 = vector.shape_cast %39 : vector<1xf32> to vector<1x1x1xf32>
    %41 = vector.extract %40[0, 0, 0] : f32 from vector<1x1x1xf32>
    %42 = vector.broadcast %35 : f32 to vector<1x1x8x128xf32>
    %c0_12 = arith.constant 0 : index
    %c0_13 = arith.constant 0 : index
    %c0_14 = arith.constant 0 : index
    %c0_15 = arith.constant 0 : index
    %43 = vector.load %arg4[%c0_12, %c0_13, %c0_14, %c0_15] : memref<1x1x8x128xf32, #tpu.memory_space<vmem>>, vector<1x1x8x128xf32>
    tpu.vector_store %arg4[%c0_12, %c0_13, %c0_14, %c0_15], %42 {strides = array<i32>} : memref<1x1x8x128xf32, #tpu.memory_space<vmem>>, vector<1x1x8x128xf32>,
    %44 = vector.broadcast %41 : f32 to vector<1x1x8x128xf32>
    %c0_16 = arith.constant 0 : index
    %c0_17 = arith.constant 0 : index
    %c0_18 = arith.constant 0 : index
    %c0_19 = arith.constant 0 : index
    %45 = vector.load %arg5[%c0_16, %c0_17, %c0_18, %c0_19] : memref<1x1x8x128xf32, #tpu.memory_space<vmem>>, vector<1x1x8x128xf32>
    tpu.vector_store %arg5[%c0_16, %c0_17, %c0_18, %c0_19], %44 {strides = array<i32>} : memref<1x1x8x128xf32, #tpu.memory_space<vmem>>, vector<1x1x8x128xf32>,
    return
  }
  func.func @transform_0(%arg0: i32, %arg1: i32) -> (i32, i32, i32) {
    %c0_i32 = arith.constant 0 : i32
    %c0_i32_0 = arith.constant 0 : i32
    return %arg0, %c0_i32, %arg1 : i32, i32, i32
  }
  func.func @transform_1(%arg0: i32, %arg1: i32) -> (i32, i32, i32) {
    %c0_i32 = arith.constant 0 : i32
    %c0_i32_0 = arith.constant 0 : i32
    return %arg0, %c0_i32, %arg1 : i32, i32, i32
  }
  func.func @transform_2(%arg0: i32, %arg1: i32) -> (i32, i32, i32, i32) {
    %c0_i32 = arith.constant 0 : i32
    %c0_i32_0 = arith.constant 0 : i32
    %c0_i32_1 = arith.constant 0 : i32
    return %arg0, %arg1, %c0_i32, %c0_i32_0 : i32, i32, i32, i32
  }
  func.func @transform_3(%arg0: i32, %arg1: i32) -> (i32, i32, i32, i32) {
    %c0_i32 = arith.constant 0 : i32
    %c0_i32_0 = arith.constant 0 : i32
    %c0_i32_1 = arith.constant 0 : i32
    return %arg0, %arg1, %c0_i32, %c0_i32_0 : i32, i32, i32, i32
  }
}

module attributes {stable_mosaic.version = 11 : i64} {
  func.func @_ce_kernel(%arg0: i32, %arg1: i32, %arg2: memref<1x1x128xi32, #tpu.memory_space<vmem>>, %arg3: memref<1x21x128xbf16, #tpu.memory_space<vmem>>, %arg4: memref<1x1x8x128xf32, #tpu.memory_space<vmem>>, %arg5: memref<1x1x8x128xf32, #tpu.memory_space<vmem>>) attributes {dimension_semantics = [#tpu.dimension_semantics<parallel>, #tpu.dimension_semantics<parallel>], iteration_bounds = array<i64: 2, 1>, scalar_prefetch = 0 : i64, scratch_operands = 0 : i64, tpu.core_type = #tpu.core_type<tc>, window_params = [{transform_indices = @transform_0, window_bounds = array<i64: 1, 1, 128>}, {transform_indices = @transform_1, window_bounds = array<i64: 1, 21, 128>}, {transform_indices = @transform_2, window_bounds = array<i64: 1, 1, 8, 128>}, {transform_indices = @transform_3, window_bounds = array<i64: 1, 1, 8, 128>}]} {
    %c0 = arith.constant 0 : index
    %c0_0 = arith.constant 0 : index
    %c0_1 = arith.constant 0 : index
    %0 = vector.load %arg3[%c0, %c0_0, %c0_1] : memref<1x21x128xbf16, #tpu.memory_space<vmem>>, vector<1x21x128xbf16>
    %1 = vector.shape_cast %0 : vector<1x21x128xbf16> to vector<21x128xbf16>
    %2 = arith.extf %1 : vector<21x128xbf16> to vector<21x128xf32>
    %c0_2 = arith.constant 0 : index
    %c0_3 = arith.constant 0 : index
    %c0_4 = arith.constant 0 : index
    %3 = vector.load %arg2[%c0_2, %c0_3, %c0_4] : memref<1x1x128xi32, #tpu.memory_space<vmem>>, vector<1x1x128xi32>
    %4 = vector.shape_cast %3 : vector<1x1x128xi32> to vector<1x128xi32>
    %5 = tpu.iota {dimensions = array<i32: 1>} : vector<1x128xi32>
    %c128_i32 = arith.constant 128 : i32
    %6 = arith.muli %arg1, %c128_i32 : i32
    %7 = vector.broadcast %6 : i32 to vector<1x128xi32>
    %8 = arith.addi %7, %5 : vector<1x128xi32>
    %c64_i32 = arith.constant 64 : i32
    %9 = vector.broadcast %c64_i32 : i32 to vector<1x128xi32>
    %10 = arith.cmpi slt, %8, %9 : vector<1x128xi32>
    %cst = arith.constant dense<0xFF800000> : vector<128xf32>
    %11 = vector.multi_reduction <maximumf>, %2, %cst [0] : vector<21x128xf32> to vector<128xf32>
    %12 = vector.shape_cast %11 : vector<128xf32> to vector<1x128xf32>
    %13 = vector.broadcast %12 : vector<1x128xf32> to vector<21x128xf32>
    %14 = arith.subf %2, %13 : vector<21x128xf32>
    %15 = math.exp %14 : vector<21x128xf32>
    %cst_5 = arith.constant dense<0.000000e+00> : vector<128xf32>
    %16 = vector.multi_reduction <add>, %15, %cst_5 [0] : vector<21x128xf32> to vector<128xf32>
    %17 = vector.shape_cast %16 : vector<128xf32> to vector<1x128xf32>
    %18 = math.log %17 : vector<1x128xf32>
    %19 = arith.addf %12, %18 : vector<1x128xf32>
    %20 = tpu.iota {dimensions = array<i32: 0>} : vector<21x128xi32>
    %21 = vector.broadcast %4 : vector<1x128xi32> to vector<21x128xi32>
    %22 = arith.cmpi eq, %20, %21 : vector<21x128xi32>
    %cst_6 = arith.constant 0.000000e+00 : f32
    %23 = vector.broadcast %cst_6 : f32 to vector<21x128xf32>
    %24 = arith.select %22, %2, %23 : vector<21x128xi1>, vector<21x128xf32>
    %cst_7 = arith.constant dense<0.000000e+00> : vector<128xf32>
    %25 = vector.multi_reduction <add>, %24, %cst_7 [0] : vector<21x128xf32> to vector<128xf32>
    %26 = vector.shape_cast %25 : vector<128xf32> to vector<1x128xf32>
    %c255_i32 = arith.constant 255 : i32
    %27 = vector.broadcast %c255_i32 : i32 to vector<1x128xi32>
    %28 = arith.cmpi ne, %4, %27 : vector<1x128xi32>
    %29 = arith.andi %28, %10 : vector<1x128xi1>
    %30 = arith.subf %19, %26 : vector<1x128xf32>
    %cst_8 = arith.constant 0.000000e+00 : f32
    %31 = vector.broadcast %cst_8 : f32 to vector<1x128xf32>
    %32 = arith.select %29, %30, %31 : vector<1x128xi1>, vector<1x128xf32>
    %33 = vector.shape_cast %32 : vector<1x128xf32> to vector<1x1x128xf32>
    %cst_9 = arith.constant dense<0.000000e+00> : vector<1xf32>
    %34 = vector.multi_reduction <add>, %33, %cst_9 [1, 2] : vector<1x1x128xf32> to vector<1xf32>
    %35 = vector.shape_cast %34 : vector<1xf32> to vector<1x1x1xf32>
    %36 = vector.extract %35[0, 0, 0] : f32 from vector<1x1x1xf32>
    %37 = arith.extui %29 : vector<1x128xi1> to vector<1x128xi32>
    %38 = arith.sitofp %37 : vector<1x128xi32> to vector<1x128xf32>
    %39 = vector.shape_cast %38 : vector<1x128xf32> to vector<1x1x128xf32>
    %cst_10 = arith.constant dense<0.000000e+00> : vector<1xf32>
    %40 = vector.multi_reduction <add>, %39, %cst_10 [1, 2] : vector<1x1x128xf32> to vector<1xf32>
    %41 = vector.shape_cast %40 : vector<1xf32> to vector<1x1x1xf32>
    %42 = vector.extract %41[0, 0, 0] : f32 from vector<1x1x1xf32>
    %43 = vector.broadcast %36 : f32 to vector<1x1x8x128xf32>
    %c0_11 = arith.constant 0 : index
    %c0_12 = arith.constant 0 : index
    %c0_13 = arith.constant 0 : index
    %c0_14 = arith.constant 0 : index
    %44 = vector.load %arg4[%c0_11, %c0_12, %c0_13, %c0_14] : memref<1x1x8x128xf32, #tpu.memory_space<vmem>>, vector<1x1x8x128xf32>
    tpu.vector_store %arg4[%c0_11, %c0_12, %c0_13, %c0_14], %43 {strides = array<i32>} : memref<1x1x8x128xf32, #tpu.memory_space<vmem>>, vector<1x1x8x128xf32>,
    %45 = vector.broadcast %42 : f32 to vector<1x1x8x128xf32>
    %c0_15 = arith.constant 0 : index
    %c0_16 = arith.constant 0 : index
    %c0_17 = arith.constant 0 : index
    %c0_18 = arith.constant 0 : index
    %46 = vector.load %arg5[%c0_15, %c0_16, %c0_17, %c0_18] : memref<1x1x8x128xf32, #tpu.memory_space<vmem>>, vector<1x1x8x128xf32>
    tpu.vector_store %arg5[%c0_15, %c0_16, %c0_17, %c0_18], %45 {strides = array<i32>} : memref<1x1x8x128xf32, #tpu.memory_space<vmem>>, vector<1x1x8x128xf32>,
    return
  }
  func.func @transform_0(%arg0: i32, %arg1: i32) -> (i32, i32, i32) {
    %c0_i32 = arith.constant 0 : i32
    %c0_i32_0 = arith.constant 0 : i32
    return %arg0, %c0_i32, %arg1 : i32, i32, i32
  }
  func.func @transform_1(%arg0: i32, %arg1: i32) -> (i32, i32, i32) {
    %c0_i32 = arith.constant 0 : i32
    %c0_i32_0 = arith.constant 0 : i32
    return %arg0, %c0_i32, %arg1 : i32, i32, i32
  }
  func.func @transform_2(%arg0: i32, %arg1: i32) -> (i32, i32, i32, i32) {
    %c0_i32 = arith.constant 0 : i32
    %c0_i32_0 = arith.constant 0 : i32
    %c0_i32_1 = arith.constant 0 : i32
    return %arg0, %arg1, %c0_i32, %c0_i32_0 : i32, i32, i32, i32
  }
  func.func @transform_3(%arg0: i32, %arg1: i32) -> (i32, i32, i32, i32) {
    %c0_i32 = arith.constant 0 : i32
    %c0_i32_0 = arith.constant 0 : i32
    %c0_i32_1 = arith.constant 0 : i32
    return %arg0, %arg1, %c0_i32, %c0_i32_0 : i32, i32, i32, i32
  }
}

module attributes {stable_mosaic.version = 11 : i64} {
  func.func @_ce_kernel(%arg0: i32, %arg1: i32, %arg2: memref<1x1x256xi32, #tpu.memory_space<vmem>>, %arg3: memref<1x21x256xbf16, #tpu.memory_space<vmem>>, %arg4: memref<1x1x8x128xf32, #tpu.memory_space<vmem>>, %arg5: memref<1x1x8x128xf32, #tpu.memory_space<vmem>>) attributes {dimension_semantics = [#tpu.dimension_semantics<parallel>, #tpu.dimension_semantics<parallel>], iteration_bounds = array<i64: 2, 1>, scalar_prefetch = 0 : i64, scratch_operands = 0 : i64, tpu.core_type = #tpu.core_type<tc>, window_params = [{transform_indices = @transform_0, window_bounds = array<i64: 1, 1, 256>}, {transform_indices = @transform_1, window_bounds = array<i64: 1, 21, 256>}, {transform_indices = @transform_2, window_bounds = array<i64: 1, 1, 8, 128>}, {transform_indices = @transform_3, window_bounds = array<i64: 1, 1, 8, 128>}]} {
    %c0 = arith.constant 0 : index
    %c0_0 = arith.constant 0 : index
    %c0_1 = arith.constant 0 : index
    %0 = vector.load %arg3[%c0, %c0_0, %c0_1] : memref<1x21x256xbf16, #tpu.memory_space<vmem>>, vector<1x21x256xbf16>
    %1 = vector.shape_cast %0 : vector<1x21x256xbf16> to vector<21x256xbf16>
    %2 = arith.extf %1 : vector<21x256xbf16> to vector<21x256xf32>
    %c0_2 = arith.constant 0 : index
    %c0_3 = arith.constant 0 : index
    %c0_4 = arith.constant 0 : index
    %3 = vector.load %arg2[%c0_2, %c0_3, %c0_4] : memref<1x1x256xi32, #tpu.memory_space<vmem>>, vector<1x1x256xi32>
    %4 = vector.shape_cast %3 : vector<1x1x256xi32> to vector<1x256xi32>
    %5 = tpu.iota {dimensions = array<i32: 1>} : vector<1x256xi32>
    %c256_i32 = arith.constant 256 : i32
    %6 = arith.muli %arg1, %c256_i32 : i32
    %7 = vector.broadcast %6 : i32 to vector<1x256xi32>
    %8 = arith.addi %7, %5 : vector<1x256xi32>
    %c144_i32 = arith.constant 144 : i32
    %9 = vector.broadcast %c144_i32 : i32 to vector<1x256xi32>
    %10 = arith.cmpi slt, %8, %9 : vector<1x256xi32>
    %cst = arith.constant dense<0xFF800000> : vector<256xf32>
    %11 = vector.multi_reduction <maximumf>, %2, %cst [0] : vector<21x256xf32> to vector<256xf32>
    %12 = vector.shape_cast %11 : vector<256xf32> to vector<1x256xf32>
    %13 = vector.broadcast %12 : vector<1x256xf32> to vector<21x256xf32>
    %14 = arith.subf %2, %13 : vector<21x256xf32>
    %15 = math.exp %14 : vector<21x256xf32>
    %cst_5 = arith.constant dense<0.000000e+00> : vector<256xf32>
    %16 = vector.multi_reduction <add>, %15, %cst_5 [0] : vector<21x256xf32> to vector<256xf32>
    %17 = vector.shape_cast %16 : vector<256xf32> to vector<1x256xf32>
    %18 = math.log %17 : vector<1x256xf32>
    %19 = arith.addf %12, %18 : vector<1x256xf32>
    %20 = tpu.iota {dimensions = array<i32: 0>} : vector<21x256xi32>
    %21 = vector.broadcast %4 : vector<1x256xi32> to vector<21x256xi32>
    %22 = arith.cmpi eq, %20, %21 : vector<21x256xi32>
    %cst_6 = arith.constant 0.000000e+00 : f32
    %23 = vector.broadcast %cst_6 : f32 to vector<21x256xf32>
    %24 = arith.select %22, %2, %23 : vector<21x256xi1>, vector<21x256xf32>
    %cst_7 = arith.constant dense<0.000000e+00> : vector<256xf32>
    %25 = vector.multi_reduction <add>, %24, %cst_7 [0] : vector<21x256xf32> to vector<256xf32>
    %26 = vector.shape_cast %25 : vector<256xf32> to vector<1x256xf32>
    %c255_i32 = arith.constant 255 : i32
    %27 = vector.broadcast %c255_i32 : i32 to vector<1x256xi32>
    %28 = arith.cmpi ne, %4, %27 : vector<1x256xi32>
    %29 = arith.andi %28, %10 : vector<1x256xi1>
    %30 = arith.subf %19, %26 : vector<1x256xf32>
    %cst_8 = arith.constant 0.000000e+00 : f32
    %31 = vector.broadcast %cst_8 : f32 to vector<1x256xf32>
    %32 = arith.select %29, %30, %31 : vector<1x256xi1>, vector<1x256xf32>
    %33 = vector.shape_cast %32 : vector<1x256xf32> to vector<1x1x256xf32>
    %cst_9 = arith.constant dense<0.000000e+00> : vector<1xf32>
    %34 = vector.multi_reduction <add>, %33, %cst_9 [1, 2] : vector<1x1x256xf32> to vector<1xf32>
    %35 = vector.shape_cast %34 : vector<1xf32> to vector<1x1x1xf32>
    %36 = vector.extract %35[0, 0, 0] : f32 from vector<1x1x1xf32>
    %37 = arith.extui %29 : vector<1x256xi1> to vector<1x256xi32>
    %38 = arith.sitofp %37 : vector<1x256xi32> to vector<1x256xf32>
    %39 = vector.shape_cast %38 : vector<1x256xf32> to vector<1x1x256xf32>
    %cst_10 = arith.constant dense<0.000000e+00> : vector<1xf32>
    %40 = vector.multi_reduction <add>, %39, %cst_10 [1, 2] : vector<1x1x256xf32> to vector<1xf32>
    %41 = vector.shape_cast %40 : vector<1xf32> to vector<1x1x1xf32>
    %42 = vector.extract %41[0, 0, 0] : f32 from vector<1x1x1xf32>
    %43 = vector.broadcast %36 : f32 to vector<1x1x8x128xf32>
    %c0_11 = arith.constant 0 : index
    %c0_12 = arith.constant 0 : index
    %c0_13 = arith.constant 0 : index
    %c0_14 = arith.constant 0 : index
    %44 = vector.load %arg4[%c0_11, %c0_12, %c0_13, %c0_14] : memref<1x1x8x128xf32, #tpu.memory_space<vmem>>, vector<1x1x8x128xf32>
    tpu.vector_store %arg4[%c0_11, %c0_12, %c0_13, %c0_14], %43 {strides = array<i32>} : memref<1x1x8x128xf32, #tpu.memory_space<vmem>>, vector<1x1x8x128xf32>,
    %45 = vector.broadcast %42 : f32 to vector<1x1x8x128xf32>
    %c0_15 = arith.constant 0 : index
    %c0_16 = arith.constant 0 : index
    %c0_17 = arith.constant 0 : index
    %c0_18 = arith.constant 0 : index
    %46 = vector.load %arg5[%c0_15, %c0_16, %c0_17, %c0_18] : memref<1x1x8x128xf32, #tpu.memory_space<vmem>>, vector<1x1x8x128xf32>
    tpu.vector_store %arg5[%c0_15, %c0_16, %c0_17, %c0_18], %45 {strides = array<i32>} : memref<1x1x8x128xf32, #tpu.memory_space<vmem>>, vector<1x1x8x128xf32>,
    return
  }
  func.func @transform_0(%arg0: i32, %arg1: i32) -> (i32, i32, i32) {
    %c0_i32 = arith.constant 0 : i32
    %c0_i32_0 = arith.constant 0 : i32
    return %arg0, %c0_i32, %arg1 : i32, i32, i32
  }
  func.func @transform_1(%arg0: i32, %arg1: i32) -> (i32, i32, i32) {
    %c0_i32 = arith.constant 0 : i32
    %c0_i32_0 = arith.constant 0 : i32
    return %arg0, %c0_i32, %arg1 : i32, i32, i32
  }
  func.func @transform_2(%arg0: i32, %arg1: i32) -> (i32, i32, i32, i32) {
    %c0_i32 = arith.constant 0 : i32
    %c0_i32_0 = arith.constant 0 : i32
    %c0_i32_1 = arith.constant 0 : i32
    return %arg0, %arg1, %c0_i32, %c0_i32_0 : i32, i32, i32, i32
  }
  func.func @transform_3(%arg0: i32, %arg1: i32) -> (i32, i32, i32, i32) {
    %c0_i32 = arith.constant 0 : i32
    %c0_i32_0 = arith.constant 0 : i32
    %c0_i32_1 = arith.constant 0 : i32
    return %arg0, %arg1, %c0_i32, %c0_i32_0 : i32, i32, i32, i32
  }
}

</mosaic_0001>

<bundles_post_ra>
// kernel: squeeze.0
= control target key start
LH: loop header
LB: loop body
LE: loop exit
PB: predicated region body
PF: predicated region fallthrough
CT: control target
= control target key end

     0   :  { %s7_s6 = smov 3  ;;  %s10_s7 = smov 3  ;;  %vm12_vm0 = vcmask 64512   ;;  %vm4_vm1 = vcmask 97280   ;;  %vm16_vm2 = vcmask 31744   ;;  %vm19_vm3 = vcmask 1048512   ;;  %s220_s0 = inlined_call_operand.vmem [shape: s32[2,12,12], index: 0, kind: input, shape index: {}]   ;;  %s221_s1 = inlined_call_operand.vmem [shape: s32[2,1,144], index: 1, kind: output, shape index: {}]  }
   0x1   :  { %v122_v0 = vld [vmem:[%s220_s0 + $0xa] ss:$16 sm:%s7_s6]   ;;  %s29_s12 = smov 3  ;;  %s22_s15 = smov 3  ;;  %vm26_vm4 = vcmask 982880   ;;  %vm33_vm5 = vcmask 884480  }
   0x2   :  { %v123_v1 = vld [vmem:[%s220_s0 + $0xa] ss:$16 sm:%s10_s7]   ;;  %v125_v3 = vld [vmem:[%s220_s0 + $0x8] ss:$16 sm:%s29_s12]   ;;  %s148_s16 = smov 120   ;;  %s149_s17 = smov 96  }
   0x3   :  { %v13_v2 = vsel %vm12_vm0, %v123_v1, %v122_v0  ;;  %31 = vrot.lane.b32.xlu1 %v125_v3, %s149_s17  ;;  %s36_s18 = smov 3  ;;  %v124_v4 = vld [vmem:[%s220_s0 + $0x9] ss:$16 sm:%s22_s15]   ;;  %s43_s23 = smov 3  ;;  %vm40_vm6 = vcmask 786080   ;;  %vm47_vm7 = vcmask 687680  }
   0x4   :  { %14 = vrot.lane.b32.xlu0 %v13_v2, %s148_s16  ;;  %v126_v5 = vld [vmem:[%s220_s0 + $0x7] ss:$16 sm:%s36_s18]   ;;  %s50_s24 = smov 3  ;;  %s150_s25 = smov 108   ;;  %vm54_vm8 = vcmask 589280   ;;  %vm61_vm9 = vcmask 490880  }
   0x5   :  { %s151_s26 = smov 84   ;;  %v127_v6 = vld [vmem:[%s220_s0 + $0x6] ss:$16 sm:%s43_s23]   ;;  %v128_v7 = vld [vmem:[%s220_s0 + $0x5] ss:$16 sm:%s50_s24]   ;;  %s57_s2 = smov 3 }
   0x6   :  { %s64_s3 = smov 3  ;;  %s152_s4 = smov 72   ;;  %v129_v8 = vld [vmem:[%s220_s0 + $0x4] ss:$16 sm:%s57_s2]   ;;  %vm68_vm10 = vcmask 392480   ;;  %vm75_vm11 = vcmask 294080  }
   0x7   :  { %38 = vrot.lane.b32.xlu1 %v126_v5, %s151_s26  ;;  %s153_s5 = smov 60   ;;  %s2_s8 = smov 3  ;;  %v130_v9 = vld [vmem:[%s220_s0 + $0x3] ss:$16 sm:%s64_s3]   ;;  %vm82_vm12 = vcmask 195680   ;;  %vm89_vm13 = vcmask 130080  }
   0x8   :  { %24 = vrot.lane.b32.xlu0 %v124_v4, %s150_s25  ;;  %v3_v10 = vld [vmem:[%s220_s0] ss:$16 sm:%s2_s8]   ;;  %s71_s13 = smov 3  ;;  %s78_s14 = smov 3 }
   0x9   :  { %5 = vst.msk [vmem:[#allocation0] ss:$16 sm:$0x3] %vm4_vm1, %v3_v10   ;;  %s154_s15 = smov 48   ;;  %s155_s16 = smov 36  }
   0xa   :  { %v131_v11 = vld [vmem:[%s220_s0 + $0x2] ss:$16 sm:%s71_s13]   ;;  %v132_v12 = vld [vmem:[%s220_s0 + $0x1] ss:$16 sm:%s78_s14]   ;;  %s85_s21 = smov 3  ;;  %s156_s22 = smov 24  }
   0xb   :  { %52 = vrot.lane.b32.xlu1 %v128_v7, %s153_s5  ;;  %s157_s23 = smov 12   ;;  %v133_v13 = vld [vmem:[%s220_s0 + $0xb] ss:$16 sm:%s85_s21]   ;;  %s158_s0 = smov 4  }
   0xc   :  { %45 = vrot.lane.b32.xlu0 %v127_v6, %s152_s4 }
   0xf   :  { %66 = vrot.lane.b32.xlu1 %v130_v9, %s155_s16 }
  0x10   :  { %59 = vrot.lane.b32.xlu0 %v129_v8, %s154_s15 }
  0x13   :  { %80 = vrot.lane.b32.xlu1 %v132_v12, %s157_s23 }
  0x14   :  { %73 = vrot.lane.b32.xlu0 %v131_v11, %s156_s22 }
  0x18   :  { %87 = vrot.lane.b32.xlu0 %v133_v13, %s158_s0 }
  0x75   :  { %v32_v15 = vpop.permute.xlu1 %31  }
  0x76   :  { %v15_v14 = vpop.permute.xlu0 %14  }
  0x77   :  { %18 = vst.msk [vmem:[#allocation0 + $0x8] ss:$16 sm:$0x3] %vm16_vm2, %v15_v14  }
  0x78   :  { %20 = vst.msk [vmem:[#allocation0] ss:$16 sm:$0x3] %vm19_vm3, %v15_v14  }
  0x79   :  { %v39_v17 = vpop.permute.xlu1 %38  }
  0x7a   :  { %v25_v16 = vpop.permute.xlu0 %24  }
  0x7b   :  { %27 = vst.msk [vmem:[#allocation0] ss:$16 sm:$0x3] %vm26_vm4, %v25_v16  }
  0x7c   :  { %34 = vst.msk [vmem:[#allocation0] ss:$16 sm:$0x3] %vm33_vm5, %v32_v15  }
  0x7d   :  { %41 = vst.msk [vmem:[#allocation0] ss:$16 sm:$0x3] %vm40_vm6, %v39_v17   ;;  %v53_v19 = vpop.permute.xlu1 %52  }
  0x7e   :  { %v46_v18 = vpop.permute.xlu0 %45  }
  0x7f   :  { %48 = vst.msk [vmem:[#allocation0] ss:$16 sm:$0x3] %vm47_vm7, %v46_v18  }
  0x80   :  { %55 = vst.msk [vmem:[#allocation0] ss:$16 sm:$0x3] %vm54_vm8, %v53_v19  }
  0x81   :  { %v67_v21 = vpop.permute.xlu1 %66  }
  0x82   :  { %v60_v20 = vpop.permute.xlu0 %59  }
  0x83   :  { %62 = vst.msk [vmem:[#allocation0] ss:$16 sm:$0x3] %vm61_vm9, %v60_v20  }
  0x84   :  { %69 = vst.msk [vmem:[#allocation0] ss:$16 sm:$0x3] %vm68_vm10, %v67_v21  }
  0x85   :  { %v81_v23 = vpop.permute.xlu1 %80  }
  0x86   :  { %v74_v22 = vpop.permute.xlu0 %73  }
  0x87   :  { %76 = vst.msk [vmem:[#allocation0] ss:$16 sm:$0x3] %vm75_vm11, %v74_v22  }
  0x88   :  { %83 = vst.msk [vmem:[#allocation0] ss:$16 sm:$0x3] %vm82_vm12, %v81_v23  }
  0x8a   :  { %v88_v24 = vpop.permute.xlu0 %87  }
  0x8b   :  { %91 = vst.msk [vmem:[#allocation0 + $0x8] ss:$16 sm:$0x3] %vm89_vm13, %v88_v24  }
  0x8f   :  { %v96_v25 = vld [vmem:[#allocation0] sm:$0x1]  ;;  %v107_v26 = vld [vmem:[#allocation0 + $0x10] sm:$0x1] }
  0x90   :  { %99 = vst [vmem:[%s221_s1] sm:$0x1] %v96_v25  ;;  %135 = vst [vmem:[%s221_s1 + $0x2] sm:$0x1] %v107_v26 }
  0x92   :  { %v101_v27 = vld [vmem:[#allocation0 + $0x8] sm:$0x1]  ;;  %v114_v28 = vld [vmem:[#allocation0 + $0x18] sm:$0x1] }
  0x93   :  { %134 = vst [vmem:[%s221_s1 + $0x1] sm:$0x1] %v101_v27  ;;  %136 = vst [vmem:[%s221_s1 + $0x3] sm:$0x1] %v114_v28 }

// kernel: squeeze.16
= control target key start
LH: loop header
LB: loop body
LE: loop exit
PB: predicated region body
PF: predicated region fallthrough
CT: control target
= control target key end

     0   :  { %s7_s6 = smov 3  ;;  %s21_s9 = smov 3  ;;  %vm4_vm0 = vcmask 64512   ;;  %vm11_vm1 = vcmask 523712   ;;  %vm18_vm2 = vcmask 458112   ;;  %vm25_vm3 = vcmask 392512   ;;  %s121_s0 = inlined_call_operand.vmem [shape: s32[2,8,8], index: 0, kind: input, shape index: {}]   ;;  %s122_s1 = inlined_call_operand.vmem [shape: s32[2,1,64], index: 1, kind: output, shape index: {}]  }
   0x1   :  { %v63_v0 = vld [vmem:[%s121_s0 + $0x7] ss:$8 sm:%s7_s6]   ;;  %s77_s10 = smov 56   ;;  %v65_v1 = vld [vmem:[%s121_s0 + $0x5] ss:$8 sm:%s21_s9]   ;;  %s14_s13 = smov 3 }
   0x2   :  { %9 = vrot.lane.b32.xlu0 %v63_v0, %s77_s10  ;;  %s78_s14 = smov 40   ;;  %v64_v2 = vld [vmem:[%s121_s0 + $0x6] ss:$8 sm:%s14_s13]   ;;  %s28_s17 = smov 3  ;;  %vm32_vm4 = vcmask 326912   ;;  %vm39_vm5 = vcmask 261312  }
   0x3   :  { %23 = vrot.lane.b32.xlu1 %v65_v1, %s78_s14  ;;  %v66_v3 = vld [vmem:[%s121_s0 + $0x4] ss:$8 sm:%s28_s17]   ;;  %s35_s20 = smov 3  ;;  %s42_s21 = smov 3  ;;  %vm46_vm6 = vcmask 195712   ;;  %vm53_vm7 = vcmask 130112  }
   0x4   :  { %s79_s22 = smov 48   ;;  %s80_s23 = smov 32   ;;  %v67_v4 = vld [vmem:[%s121_s0 + $0x3] ss:$8 sm:%s35_s20]   ;;  %v68_v5 = vld [vmem:[%s121_s0 + $0x2] ss:$8 sm:%s42_s21]  }
   0x5   :  { %s2_s26 = smov 3  ;;  %s49_s29 = smov 3 }
   0x6   :  { %16 = vrot.lane.b32.xlu0 %v64_v2, %s79_s22  ;;  %v3_v6 = vld [vmem:[%s121_s0] ss:$8 sm:%s2_s26]   ;;  %s81_s3 = smov 24   ;;  %s82_s4 = smov 16  }
   0x7   :  { %30 = vrot.lane.b32.xlu1 %v66_v3, %s80_s23  ;;  %5 = vst.msk [vmem:[#allocation0] sm:$0x3] %vm4_vm0, %v3_v6   ;;  %v69_v7 = vld [vmem:[%s121_s0 + $0x1] ss:$8 sm:%s49_s29]   ;;  %s83_s0 = smov 8  }
   0xa   :  { %37 = vrot.lane.b32.xlu0 %v67_v4, %s81_s3 }
   0xb   :  { %44 = vrot.lane.b32.xlu1 %v68_v5, %s82_s4 }
   0xe   :  { %51 = vrot.lane.b32.xlu0 %v69_v7, %s83_s0 }
  0x74   :  { %v10_v8 = vpop.permute.xlu0 %9  }
  0x75   :  { %12 = vst.msk [vmem:[#allocation0] sm:$0x3] %vm11_vm1, %v10_v8   ;;  %v24_v9 = vpop.permute.xlu1 %23  }
  0x78   :  { %v17_v10 = vpop.permute.xlu0 %16  }
  0x79   :  { %19 = vst.msk [vmem:[#allocation0] sm:$0x3] %vm18_vm2, %v17_v10   ;;  %v31_v11 = vpop.permute.xlu1 %30  }
  0x7a   :  { %26 = vst.msk [vmem:[#allocation0] sm:$0x3] %vm25_vm3, %v24_v9  }
  0x7b   :  { %33 = vst.msk [vmem:[#allocation0] sm:$0x3] %vm32_vm4, %v31_v11  }
  0x7c   :  { %v38_v12 = vpop.permute.xlu0 %37  }
  0x7d   :  { %40 = vst.msk [vmem:[#allocation0] sm:$0x3] %vm39_vm5, %v38_v12   ;;  %v45_v13 = vpop.permute.xlu1 %44  }
  0x7e   :  { %47 = vst.msk [vmem:[#allocation0] sm:$0x3] %vm46_vm6, %v45_v13  }
  0x80   :  { %v52_v14 = vpop.permute.xlu0 %51  }
  0x81   :  { %54 = vst.msk [vmem:[#allocation0] sm:$0x3] %vm53_vm7, %v52_v14  }
  0x88   :  { %v59_v15 = vld [vmem:[#allocation0] sm:$0x3] }
  0x89   :  { %62 = vst [vmem:[%s122_s1] sm:$0x3] %v59_v15 }

// kernel: squeeze.13
= control target key start
LH: loop header
LB: loop body
LE: loop exit
PB: predicated region body
PF: predicated region fallthrough
CT: control target
= control target key end

     0   :  { %s30_s10 = smov 3  ;;  %s11_s11 = smov 3  ;;  %vm13_vm0 = vcmask 31744   ;;  %vm20_vm1 = vcmask 130144   ;;  %vm27_vm2 = vcmask 97344   ;;  %vm34_vm3 = vcmask 64544   ;;  %s70_s0 = inlined_call_operand.vmem [shape: s32[2,4,4], index: 0, kind: input, shape index: {}]   ;;  %s71_s1 = inlined_call_operand.vmem [shape: s32[2,1,16], index: 1, kind: output, shape index: {}]  }
   0x1   :  { %v44_v0 = vld [vmem:[%s70_s0 + $0x4] sm:$0xf]  ;;  %v9_v1 = vld [vmem:[%s70_s0] sm:$0xf]  ;;  %s16_s0 = smov 3  ;;  %s23_s12 = smov 3 }
   0x2   :  { %8 = vst [vmem:[#allocation1 + $0x8] sm:$0xf] %v44_v0  ;;  %10 = vst [vmem:[#allocation1] sm:$0xf] %v9_v1  ;;  %s48_s13 = smov 12   ;;  %s49_s14 = smov 4  }
   0x3   :  { %s50_s15 = smov 8  }
   0x9   :  { %v17_v2 = vld [vmem:[#allocation1 + $0x3] ss:$8 sm:%s16_s0]   ;;  %v31_v3 = vld [vmem:[#allocation1 + $0x1] ss:$8 sm:%s30_s10]   ;;  %v12_v4 = vld [vmem:[#allocation1] ss:$8 sm:%s11_s11]  }
   0xa   :  { %18 = vrot.lane.b32.xlu0 %v17_v2, %s48_s13  ;;  %32 = vrot.lane.b32.xlu1 %v31_v3, %s49_s14  ;;  %v24_v5 = vld [vmem:[#allocation1 + $0x2] ss:$8 sm:%s23_s12]   ;;  %14 = vst.msk [vmem:[#allocation0] sm:$0x3] %vm13_vm0, %v12_v4  }
   0xe   :  { %25 = vrot.lane.b32.xlu0 %v24_v5, %s50_s15 }
  0x7c   :  { %v19_v6 = vpop.permute.xlu0 %18   ;;  %v33_v7 = vpop.permute.xlu1 %32  }
  0x7d   :  { %21 = vst.msk [vmem:[#allocation0] sm:$0x3] %vm20_vm1, %v19_v6  }
  0x80   :  { %v26_v8 = vpop.permute.xlu0 %25  }
  0x81   :  { %28 = vst.msk [vmem:[#allocation0] sm:$0x3] %vm27_vm2, %v26_v8  }
  0x82   :  { %35 = vst.msk [vmem:[#allocation0] sm:$0x3] %vm34_vm3, %v33_v7  }
  0x89   :  { %v40_v9 = vld [vmem:[#allocation0] sm:$0x3] }
  0x8a   :  { %43 = vst [vmem:[%s71_s1] sm:$0x3] %v40_v9 }

// kernel: pyramid_loss.4
= control target key start
LH: loop header
LB: loop body
LE: loop exit
PB: predicated region body
PF: predicated region fallthrough
CT: control target
= control target key end

     0   :  { %s710_s12 = smov 0   ;;  %s712_s13 = smov 0   ;;  %s821_s0 = inlined_call_operand.vmem [shape: s32[2,1,256], index: 0, kind: input, shape index: {}]   ;;  %s822_s1 = inlined_call_operand.vmem [shape: f32[2,21,256], index: 1, kind: input, shape index: {}]   ;;  %s823_s2 = inlined_call_operand.vmem [shape: f32[2,1,8,128], index: 2, kind: output, shape index: {0}]   ;;  %s824_s3 = inlined_call_operand.vmem [shape: f32[2,1,8,128], index: 3, kind: output, shape index: {1}]  }
   0x1   :  { %s714_s14 = smov 0  }
   0x2 LB: > { %s26_s15 = sadd.s32 1, %s681_s13  ;;  %p607_p0 = scmp.ge.s32.totalorder %s685_s14, 1  ;;  %s685_s14 = sphi %s714_s14, %s14_s14   ;;  %s681_s13 = sphi %s712_s13, %s826_s13   ;;  %s677_s12 = sphi %s710_s12, %s825_s12  }
   0x3   : > { %p28_p1 = scmp.ge.s32.totalorder %s26_s15, 2  ;;  %p179_p2 = scmp.lt.s32.totalorder %s685_s14, 3 }
   0x5   : > { %s828_s15 = smov (%p28_p1, %s26_s15), 0  ;;  %p180_p3 = pnand %p607_p0, %p179_p2 }
   0x6   : > { %p225_p4 = scmp.lt.s32.totalorder (!%p180_p3), %s677_s12, 1 }
   0x7   : > { %183 = sbr.rel (%p180_p3) target bundleno = 311 (0x137), region = 28 }
   0xc   : > { %s830_s12 = smov (!%p225_p4, %s677_s12), 1  ;;  %vm273_vm0 = vcmask 1044480   ;;  %v334_v30 = vlaneseq  ;;  %vm428_vm10 = vcmask 1040384  }
   0xd   : > { %s615_s16 = smul.u32 48, %s830_s12  ;;  %s608_s20 = sshll.u32 %s830_s12, 1 }
   0xe   : > { %v767_v37 = vshrl.u32 %v334_v30, 7  ;;  %s231_s23 = scalar_lea.vmem %s821_s0, %s608_s20  ;;  %v688_v30 = vmov 1   ;;  %s610_s24 = sshll.u32 %s830_s12, 3 }
   0xf   : > { %s241_s19 = scalar_lea.vmem %s822_s1, %s615_s16  ;;  %v775_v39 = vld [vmem:[%s231_s23] sm:$0x3]  ;;  %s249_s27 = scalar_lea.vmem %s823_s2, %s610_s24 }
  0x10   : > { %v734_v0 = vld [vmem:[%s241_s19] sm:$0xff]  ;;  %v736_v1 = vld [vmem:[%s241_s19 + $0x8] sm:$0xff]  ;;  %v259_v4 = vld [vmem:[%s241_s19 + $0x10] sm:$0xff]  ;;  %v773_v38 = vsub.s32 0, %v767_v37  ;;  %v778_v40 = vsub.s32 1, %v767_v37  ;;  %v336_v41 = vadd.s32 8, %v767_v37  ;;  %s256_s4 = scalar_lea.vmem %s824_s3, %s610_s24 }
  0x11   : > { %v738_v2 = vld [vmem:[%s241_s19 + $0x20] sm:$0x1f]  ;;  %v740_v3 = vld [vmem:[%s241_s19 + $0x28] sm:$0x1f]  ;;  %v742_v5 = vld [vmem:[%s241_s19 + $0x18] sm:$0xff]  ;;  %v337_v43 = vadd.s32 16, %v767_v37 }
  0x12   : > { %v274_v6 = vsel %vm273_vm0, %v738_v2, -inf  ;;  %v283_v7 = vsel %vm273_vm0, %v740_v3, -inf  ;;  %v341_v42 = vrot.slane %v775_v39, %v773_v38  ;;  %v345_v44 = vrot.slane %v775_v39, %v778_v40 }
  0x13   : > { %v275_v8 = vmax.f32 %v734_v0, %v274_v6  ;;  %v284_v9 = vmax.f32 %v736_v1, %v283_v7  ;;  %vm376_vm7 = vcmp.ne.s32.totalorder %v775_v39, 255 }
  0x14   : > { %vm346_vm1 = vcmp.eq.s32.totalorder %v767_v37, %v341_v42  ;;  %vm348_vm2 = vcmp.eq.s32.totalorder %v336_v41, %v341_v42  ;;  %vm347_vm3 = vcmp.eq.s32.totalorder %v767_v37, %v345_v44  ;;  %vm349_vm4 = vcmp.eq.s32.totalorder %v336_v41, %v345_v44 }
  0x15   : > { %v276_v10 = vmax.f32 %v275_v8, %v259_v4  ;;  %v285_v11 = vmax.f32 %v284_v9, %v742_v5  ;;  %vm350_vm5 = vcmp.eq.s32.totalorder %v337_v43, %v341_v42  ;;  %vm351_vm6 = vcmp.eq.s32.totalorder %v337_v43, %v345_v44 }
  0x16   : > { %v352_v50 = vsel %vm346_vm1, %v734_v0, 0.0  ;;  %v354_v51 = vsel %vm348_vm2, %v259_v4, 0.0  ;;  %v353_v54 = vsel %vm347_vm3, %v736_v1, 0.0  ;;  %v355_v55 = vsel %vm349_vm4, %v742_v5, 0.0 }
  0x17   : > { %v277_v12 = vrot.slane %v276_v10, 4  ;;  %v286_v13 = vrot.slane %v285_v11, 4  ;;  %v356_v56 = vsel %vm350_vm5, %v738_v2, 0.0  ;;  %v357_v59 = vsel %vm351_vm6, %v740_v3, 0.0 }
  0x18   : > { %v358_v62 = vadd.f32 %v354_v51, %v352_v50 }
  0x19   : > { %v278_v14 = vmax.f32 %v276_v10, %v277_v12  ;;  %v287_v15 = vmax.f32 %v285_v11, %v286_v13 }
  0x1b   : > { %v279_v16 = vrot.slane %v278_v14, 2  ;;  %v288_v17 = vrot.slane %v287_v15, 2 }
  0x1d   : > { %v280_v18 = vmax.f32 %v278_v14, %v279_v16  ;;  %v289_v19 = vmax.f32 %v287_v15, %v288_v17 }
  0x1f   : > { %v281_v20 = vrot.slane %v280_v18, 1  ;;  %v290_v21 = vrot.slane %v289_v19, 1 }
  0x21   : > { %v751_v22 = vmax.f32 %v280_v18, %v281_v20  ;;  %v753_v23 = vmax.f32 %v289_v19, %v290_v21  ;;  %v687_v21 = vmov 1966171168  }
  0x23   : > { %v292_v24 = vsub.f32 %v734_v0, %v751_v22  ;;  %v293_v25 = vsub.f32 %v736_v1, %v753_v23  ;;  %v294_v26 = vsub.f32 %v259_v4, %v751_v22  ;;  %v295_v27 = vsub.f32 %v742_v5, %v753_v23 }
  0x24   : > { %v296_v28 = vsub.f32 %v738_v2, %v751_v22  ;;  %v297_v29 = vsub.f32 %v740_v3, %v753_v23  ;;  %v359_v0 = vsel %vm273_vm0, %v356_v56, 0.0  ;;  %v367_v4 = vadd.f32 %v355_v55, %v353_v54 }
  0x25   : > { %v298_v31 = vmul.f32 1.442695, %v292_v24  ;;  %v300_v32 = vmul.f32 1.442695, %v293_v25  ;;  %v302_v33 = vmul.f32 1.442695, %v294_v26  ;;  %v360_v8 = vadd.f32 %v359_v0, %v358_v62 }
  0x26   : > { %v304_v34 = vmul.f32 1.442695, %v295_v27  ;;  %v306_v35 = vmul.f32 1.442695, %v296_v28  ;;  %v308_v36 = vmul.f32 1.442695, %v297_v29  ;;  %v381_v24 = vunpack.c.l.s4 %v687_v21 }
  0x27   : > { %647 = vpow2.f32 %v298_v31  ;;  %v368_v1 = vsel %vm273_vm0, %v357_v59, 0.0  ;;  %v361_v3 = vrot.slane %v360_v8, 4  ;;  %v379_v31 = vcombine.low %v688_v30, %v688_v30 }
  0x28   : > { %649 = vpow2.f32 %v300_v32  ;;  %v369_v9 = vadd.f32 %v368_v1, %v367_v4  ;;  %v382_v27 = vunpack.c.0.s8 %v381_v24 }
  0x29   : > { %651 = vpow2.f32 %v302_v33  ;;  %v362_v18 = vadd.f32 %v361_v3, %v360_v8 }
  0x2a   : > { %653 = vpow2.f32 %v304_v34  ;;  %v370_v14 = vrot.slane %v369_v9, 4  ;;  %v385_v32 = vsub.s32 %v382_v27, %v767_v37 }
  0x2b   : > { %655 = vpow2.f32 %v306_v35  ;;  %v363_v25 = vrot.slane %v362_v18, 2 }
  0x2c   : > { %657 = vpow2.f32 %v308_v36  ;;  %v371_v20 = vadd.f32 %v370_v14, %v369_v9  ;;  %v386_v35 = vrot.slane %v379_v31, %v385_v32 }
  0x2d   : > { %v364_v28 = vadd.f32 %v363_v25, %v362_v18 }
  0x2e   : > { %v372_v26 = vrot.slane %v371_v20, 2 }
  0x2f   : > { %v365_v33 = vrot.slane %v364_v28, 1 }
  0x30   : > { %v373_v29 = vadd.f32 %v372_v26, %v371_v20 }
  0x31   : > { %v366_v43 = vadd.f32 %v365_v33, %v364_v28 }
  0x32   : > { %v374_v34 = vrot.slane %v373_v29, 1 }
  0x34   : > { %v648_v45 = vpop.eup %647 }
  0x35   : > { %v650_v46 = vpop.eup %649 }
  0x36   : > { %v652_v47 = vpop.eup %651 }
  0x37   : > { %v654_v48 = vpop.eup %653  ;;  %v310_v49 = vadd.f32 %v652_v47, %v648_v45  ;;  %v375_v45 = vadd.f32 %v374_v34, %v373_v29 }
  0x38   : > { %v656_v52 = vpop.eup %655  ;;  %v319_v53 = vadd.f32 %v654_v48, %v650_v46  ;;  %v393_v46 = vrot.slane %v386_v35, %v385_v32 }
  0x39   : > { %v658_v57 = vpop.eup %657  ;;  %v311_v58 = vsel %vm273_vm0, %v656_v52, 0.0  ;;  %v689_v52 = vmov 0.0  }
  0x3a   : > { %v312_v60 = vadd.f32 %v311_v58, %v310_v49  ;;  %v320_v61 = vsel %vm273_vm0, %v658_v57, 0.0  ;;  %vm394_vm8 = vcmp.ne.s32.totalorder %v393_v46, 0 }
  0x3b   : > { %v321_v63 = vadd.f32 %v320_v61, %v319_v53  ;;  %vm395_vm9 = vmand %vm376_vm7, %vm394_vm8 }
  0x3c   : > { %v313_v6 = vrot.slane %v312_v60, 4  ;;  %v612_v53 = vsel %vm395_vm9, 1.0, %v689_v52 }
  0x3d   : > { %v322_v7 = vrot.slane %v321_v63, 4  ;;  %v447_v55 = vrot.slane %v612_v53, %v773_v38  ;;  %v451_v56 = vrot.slane %v612_v53, %v778_v40 }
  0x3e   : > { %v314_v5 = vadd.f32 %v313_v6, %v312_v60 }
  0x3f   : > { %v323_v2 = vadd.f32 %v322_v7, %v321_v63  ;;  %v454_v59 = vsel %vm428_vm10, %v447_v55, 0.0  ;;  %v455_v60 = vsel %vm428_vm10, %v451_v56, 0.0 }
  0x40   : > { %v315_v10 = vrot.slane %v314_v5, 2  ;;  %v456_v62 = vadd.f32 %v455_v60, %v454_v59 }
  0x41   : > { %v324_v11 = vrot.slane %v323_v2, 2 }
  0x42   : > { %v316_v12 = vadd.f32 %v315_v10, %v314_v5 }
  0x43   : > { %v325_v13 = vadd.f32 %v324_v11, %v323_v2 }
  0x44   : > { %v317_v15 = vrot.slane %v316_v12, 1 }
  0x45   : > { %v326_v16 = vrot.slane %v325_v13, 1 }
  0x46   : > { %v318_v17 = vadd.f32 %v317_v15, %v316_v12 }
  0x47   : > { %v327_v19 = vadd.f32 %v326_v16, %v325_v13 }
  0x48   : > { %659 = vlog2.f32 %v318_v17 }
  0x49   : > { %661 = vlog2.f32 %v327_v19 }
  0x55   : > { %v660_v36 = vpop.eup %659 }
  0x56   : > { %v662_v41 = vpop.eup %661  ;;  %v329_v42 = vmul.f32 0.6931472, %v660_v36 }
  0x57   : > { %v331_v44 = vmul.f32 0.6931472, %v662_v41 }
  0x58   : > { %v332_v47 = vadd.f32 %v329_v42, %v751_v22 }
  0x59   : > { %v333_v48 = vadd.f32 %v331_v44, %v753_v23 }
  0x5a   : > { %v396_v49 = vsub.f32 %v332_v47, %v366_v43 }
  0x5b   : > { %v397_v50 = vsub.f32 %v333_v48, %v375_v45 }
  0x5d   : > { %v400_v37 = vcombine.low %v396_v49, %v397_v50 }
  0x5f   : > { %v407_v51 = vrot.slane %v400_v37, %v385_v32 }
  0x61   : > { %v414_v54 = vrot.slane %v407_v51, %v385_v32 }
  0x63   : > { %v416_v57 = vsel %vm395_vm9, %v414_v54, 0.0 }
  0x64   : > { %v421_v22 = vrot.slane %v416_v57, %v773_v38  ;;  %v425_v23 = vrot.slane %v416_v57, %v778_v40 }
  0x66   : > { %v429_v58 = vsel %vm428_vm10, %v421_v22, 0.0  ;;  %v430_v39 = vsel %vm428_vm10, %v425_v23, 0.0 }
  0x67   : > { %v431_v61 = vadd.f32 %v430_v39, %v429_v58 }
  0x69   : > { %432 = vadd.xlane.f32.xlu0 %v431_v61 }
  0x6d   : > { %457 = vadd.xlane.f32.xlu0 %v456_v62 }
  0xf2   : > { %v433_v63 = vpop.xlane.xlu0 %432 }
  0xf3   : > { %v434_v0 = vrot.slane %v433_v63, 4 }
  0xf5   : > { %v435_v4 = vadd.f32 %v434_v0, %v433_v63 }
  0xf6   : > { %v458_v6 = vpop.xlane.xlu0 %457 }
  0xf7   : > { %v436_v1 = vrot.slane %v435_v4, 2  ;;  %v459_v7 = vrot.slane %v458_v6, 4 }
  0xf9   : > { %v460_v5 = vadd.f32 %v459_v7, %v458_v6  ;;  %v437_v8 = vadd.f32 %v436_v1, %v435_v4 }
  0xfb   : > { %v461_v38 = vrot.slane %v460_v5, 2  ;;  %v438_v2 = vrot.slane %v437_v8, 1 }
  0xfd   : > { %v462_v40 = vadd.f32 %v461_v38, %v460_v5  ;;  %v439_v9 = vadd.f32 %v438_v2, %v437_v8 }
  0xff   : > { %616 = vpush %v439_v9  ;;  %v463_v10 = vrot.slane %v462_v40, 1 }
 0x101   : > { %v464_v11 = vadd.f32 %v463_v10, %v462_v40 }
 0x103   : > { %618 = vpush %v464_v11 }
 0x130   : > { %s617_s28 = spop %616 }
 0x131   : > { %v466_v12 = vstv %s617_s28 }
 0x132   : > { %467 = vst [vmem:[%s249_s27] sm:$0xff] %v466_v12 }
 0x134   : > { %s619_s5 = spop %618 }
 0x135   : > { %v468_v3 = vstv %s619_s5 }
 0x136   : > { %469 = vst [vmem:[%s256_s4] sm:$0xff] %v468_v3 }
 0x137 PF: > { %s14_s14 = sadd.s32 1, %s685_s14   ;;  %s825_s12 = smov %s681_s13 }
 0x138   : > { %p11_p5 = scmp.ge.s32.totalorder %s14_s14, 4   ;;  %s826_s13 = smov %s828_s15 }
 0x13a   :  { %13 = sbr.rel (!%p11_p5) target bundleno = 2 (0x2), region = 73 }

// kernel: pyramid_loss.5
= control target key start
LH: loop header
LB: loop body
LE: loop exit
PB: predicated region body
PF: predicated region fallthrough
CT: control target
= control target key end

     0   :  { %s570_s12 = smov 0   ;;  %s572_s13 = smov 0   ;;  %s617_s0 = inlined_call_operand.vmem [shape: s32[2,1,128], index: 0, kind: input, shape index: {}]   ;;  %s618_s1 = inlined_call_operand.vmem [shape: bf16[2,21,128], index: 1, kind: input, shape index: {}]   ;;  %s619_s2 = inlined_call_operand.vmem [shape: f32[2,1,8,128], index: 2, kind: output, shape index: {0}]   ;;  %s620_s3 = inlined_call_operand.vmem [shape: f32[2,1,8,128], index: 3, kind: output, shape index: {1}]  }
   0x1   :  { %s574_s14 = smov 0  }
   0x2 LB: > { %s26_s15 = sadd.s32 1, %s543_s13  ;;  %p476_p0 = scmp.ge.s32.totalorder %s547_s14, 1  ;;  %s547_s14 = sphi %s574_s14, %s14_s14   ;;  %s543_s13 = sphi %s572_s13, %s622_s13   ;;  %s539_s12 = sphi %s570_s12, %s621_s12  }
   0x3   : > { %p28_p1 = scmp.ge.s32.totalorder %s26_s15, 2  ;;  %p174_p2 = scmp.lt.s32.totalorder %s547_s14, 3 }
   0x5   : > { %s624_s15 = smov (%p28_p1, %s26_s15), 0  ;;  %p175_p3 = pnand %p476_p0, %p174_p2 }
   0x6   : > { %p216_p4 = scmp.lt.s32.totalorder (!%p175_p3), %s539_s12, 1 }
   0x7   : > { %178 = sbr.rel (%p175_p3) target bundleno = 298 (0x12a), region = 28 }
   0xc   : > { %s626_s12 = smov (!%p216_p4, %s539_s12), 1  ;;  %vm257_vm0 = vcmask 1044480   ;;  %v251_v14 = vlaneseq  ;;  %vm315_vm7 = vcmask 1040384   ;;  %v549_v57 = vmov 0.0  }
   0xd   : > { %s487_s16 = smul.u32 12, %s626_s12  ;;  %s221_s22 = scalar_lea.vmem %s617_s0, %s626_s12 }
   0xe   : > { %v289_v21 = vshrl.u32 %v251_v14, 7  ;;  %v250_v23 = vld [vmem:[%s221_s22] sm:$0x1]  ;;  %v252_v49 = vand.u32 127, %v251_v14  ;;  %s478_s23 = sshll.u32 %s626_s12, 3 }
   0xf   : > { %s229_s19 = scalar_lea.vmem %s618_s1, %s487_s16  ;;  %vm311_vm5 = vcmp.ne.s32.totalorder %v250_v23, 255  ;;  %s236_s26 = scalar_lea.vmem %s619_s2, %s478_s23 }
  0x10   : > { %v484_v0 = vld [vmem:[%s229_s19] sm:$0xff]   ;;  %v246_v1 = vld [vmem:[%s229_s19 + $0x8] sm:$0x7]  ;;  %v294_v22 = vsub.s32 0, %v289_v21  ;;  %v290_v24 = vadd.s32 8, %v289_v21  ;;  %v291_v26 = vadd.s32 16, %v289_v21  ;;  %s243_s30 = scalar_lea.vmem %s620_s3, %s478_s23 }
  0x11   : > { %v485_v2 = vunpack.c.l.bf16 %v484_v0  ;;  %v486_v3 = vunpack.c.h.bf16 %v484_v0  ;;  %v249_v4 = vunpack.c.l.bf16 %v246_v1  ;;  %vm256_vm4 = vcmp.lt.s32.totalorder %v252_v49, 16 }
  0x12   : > { %v295_v25 = vrot.slane %v250_v23, %v294_v22  ;;  %vm312_vm6 = vmand %vm311_vm5, %vm256_vm4 }
  0x13   : > { %v258_v5 = vsel %vm257_vm0, %v249_v4, -inf  ;;  %v259_v6 = vmax.f32 %v485_v2, %v486_v3  ;;  %v480_v58 = vsel %vm312_vm6, 1.0, %v549_v57 }
  0x14   : > { %vm296_vm1 = vcmp.eq.s32.totalorder %v289_v21, %v295_v25  ;;  %vm297_vm2 = vcmp.eq.s32.totalorder %v290_v24, %v295_v25  ;;  %vm298_vm3 = vcmp.eq.s32.totalorder %v291_v26, %v295_v25  ;;  %v328_v60 = vsel %vm315_vm7, %v480_v58, 0.0 }
  0x15   : > { %v260_v7 = vmax.f32 %v259_v6, %v258_v5  ;;  %v299_v29 = vsel %vm296_vm1, %v485_v2, 0.0  ;;  %v300_v30 = vsel %vm297_vm2, %v486_v3, 0.0  ;;  %v301_v33 = vsel %vm298_vm3, %v249_v4, 0.0 }
  0x16   : > { %v302_v36 = vadd.f32 %v300_v30, %v299_v29  ;;  %v303_v37 = vsel %vm257_vm0, %v301_v33, 0.0 }
  0x17   : > { %v261_v8 = vrot.slane %v260_v7, 4 }
  0x18   : > { %v304_v40 = vadd.f32 %v303_v37, %v302_v36 }
  0x19   : > { %v262_v9 = vmax.f32 %v260_v7, %v261_v8 }
  0x1a   : > { %v305_v43 = vrot.slane %v304_v40, 4 }
  0x1b   : > { %v263_v10 = vrot.slane %v262_v9, 2 }
  0x1c   : > { %v306_v46 = vadd.f32 %v305_v43, %v304_v40 }
  0x1d   : > { %v264_v11 = vmax.f32 %v262_v9, %v263_v10 }
  0x1e   : > { %v307_v47 = vrot.slane %v306_v46, 2 }
  0x1f   : > { %v265_v12 = vrot.slane %v264_v11, 1 }
  0x20   : > { %v308_v48 = vadd.f32 %v307_v47, %v306_v46 }
  0x21   : > { %v266_v13 = vmax.f32 %v264_v11, %v265_v12 }
  0x22   : > { %v309_v50 = vrot.slane %v308_v48, 1 }
  0x23   : > { %v267_v15 = vsub.f32 %v485_v2, %v266_v13  ;;  %v268_v16 = vsub.f32 %v486_v3, %v266_v13  ;;  %v269_v17 = vsub.f32 %v249_v4, %v266_v13 }
  0x24   : > { %v310_v53 = vadd.f32 %v309_v50, %v308_v48 }
  0x25   : > { %v270_v18 = vmul.f32 1.442695, %v267_v15  ;;  %v272_v19 = vmul.f32 1.442695, %v268_v16  ;;  %v274_v20 = vmul.f32 1.442695, %v269_v17 }
  0x27   : > { %517 = vpow2.f32 %v270_v18 }
  0x28   : > { %519 = vpow2.f32 %v272_v19 }
  0x29   : > { %521 = vpow2.f32 %v274_v20 }
  0x34   : > { %v518_v27 = vpop.eup %517 }
  0x35   : > { %v520_v28 = vpop.eup %519 }
  0x36   : > { %v522_v31 = vpop.eup %521  ;;  %v276_v32 = vadd.f32 %v520_v28, %v518_v27 }
  0x37   : > { %v277_v34 = vsel %vm257_vm0, %v522_v31, 0.0 }
  0x38   : > { %v278_v35 = vadd.f32 %v277_v34, %v276_v32 }
  0x3a   : > { %v279_v38 = vrot.slane %v278_v35, 4 }
  0x3c   : > { %v280_v39 = vadd.f32 %v279_v38, %v278_v35 }
  0x3e   : > { %v281_v41 = vrot.slane %v280_v39, 2 }
  0x40   : > { %v282_v42 = vadd.f32 %v281_v41, %v280_v39 }
  0x42   : > { %v283_v44 = vrot.slane %v282_v42, 1 }
  0x44   : > { %v284_v45 = vadd.f32 %v283_v44, %v282_v42 }
  0x46   : > { %523 = vlog2.f32 %v284_v45 }
  0x53   : > { %v524_v51 = vpop.eup %523 }
  0x54   : > { %v286_v52 = vmul.f32 0.6931472, %v524_v51 }
  0x56   : > { %v287_v54 = vadd.f32 %v286_v52, %v266_v13 }
  0x58   : > { %v313_v55 = vsub.f32 %v287_v54, %v310_v53 }
  0x5a   : > { %v314_v56 = vsel %vm312_vm6, %v313_v55, 0.0 }
  0x5b   : > { %v316_v59 = vsel %vm315_vm7, %v314_v56, 0.0 }
  0x5c   : > { %317 = vadd.xlane.f32.xlu0 %v316_v59 }
  0x60   : > { %329 = vadd.xlane.f32.xlu0 %v328_v60 }
  0xe5   : > { %v318_v61 = vpop.xlane.xlu0 %317 }
  0xe6   : > { %v319_v62 = vrot.slane %v318_v61, 4 }
  0xe8   : > { %v320_v63 = vadd.f32 %v319_v62, %v318_v61 }
  0xe9   : > { %v330_v0 = vpop.xlane.xlu0 %329 }
  0xea   : > { %v321_v1 = vrot.slane %v320_v63, 2  ;;  %v331_v2 = vrot.slane %v330_v0, 4 }
  0xec   : > { %v332_v3 = vadd.f32 %v331_v2, %v330_v0  ;;  %v322_v4 = vadd.f32 %v321_v1, %v320_v63 }
  0xee   : > { %v333_v5 = vrot.slane %v332_v3, 2  ;;  %v323_v6 = vrot.slane %v322_v4, 1 }
  0xf0   : > { %v334_v7 = vadd.f32 %v333_v5, %v332_v3  ;;  %v324_v8 = vadd.f32 %v323_v6, %v322_v4 }
  0xf2   : > { %488 = vpush %v324_v8  ;;  %v335_v9 = vrot.slane %v334_v7, 1 }
  0xf4   : > { %v336_v10 = vadd.f32 %v335_v9, %v334_v7 }
  0xf6   : > { %490 = vpush %v336_v10 }
 0x123   : > { %s489_s27 = spop %488 }
 0x124   : > { %v338_v11 = vstv %s489_s27 }
 0x125   : > { %339 = vst [vmem:[%s236_s26] sm:$0xff] %v338_v11 }
 0x127   : > { %s491_s4 = spop %490 }
 0x128   : > { %v340_v12 = vstv %s491_s4 }
 0x129   : > { %341 = vst [vmem:[%s243_s30] sm:$0xff] %v340_v12 }
 0x12a PF: > { %s14_s14 = sadd.s32 1, %s547_s14   ;;  %s621_s12 = smov %s543_s13 }
 0x12b   : > { %p11_p5 = scmp.ge.s32.totalorder %s14_s14, 4   ;;  %s622_s13 = smov %s624_s15 }
 0x12d   :  { %13 = sbr.rel (!%p11_p5) target bundleno = 2 (0x2), region = 73 }

// kernel: pyramid_loss.6
= control target key start
LH: loop header
LB: loop body
LE: loop exit
PB: predicated region body
PF: predicated region fallthrough
CT: control target
= control target key end

     0   :  { %s570_s12 = smov 0   ;;  %s572_s13 = smov 0   ;;  %s617_s0 = inlined_call_operand.vmem [shape: s32[2,1,128], index: 0, kind: input, shape index: {}]   ;;  %s618_s1 = inlined_call_operand.vmem [shape: bf16[2,21,128], index: 1, kind: input, shape index: {}]   ;;  %s619_s2 = inlined_call_operand.vmem [shape: f32[2,1,8,128], index: 2, kind: output, shape index: {0}]   ;;  %s620_s3 = inlined_call_operand.vmem [shape: f32[2,1,8,128], index: 3, kind: output, shape index: {1}]  }
   0x1   :  { %s574_s14 = smov 0  }
   0x2 LB: > { %s26_s15 = sadd.s32 1, %s543_s13  ;;  %p476_p0 = scmp.ge.s32.totalorder %s547_s14, 1  ;;  %s547_s14 = sphi %s574_s14, %s14_s14   ;;  %s543_s13 = sphi %s572_s13, %s622_s13   ;;  %s539_s12 = sphi %s570_s12, %s621_s12  }
   0x3   : > { %p28_p1 = scmp.ge.s32.totalorder %s26_s15, 2  ;;  %p174_p2 = scmp.lt.s32.totalorder %s547_s14, 3 }
   0x5   : > { %s624_s15 = smov (%p28_p1, %s26_s15), 0  ;;  %p175_p3 = pnand %p476_p0, %p174_p2 }
   0x6   : > { %p216_p4 = scmp.lt.s32.totalorder (!%p175_p3), %s539_s12, 1 }
   0x7   : > { %178 = sbr.rel (%p175_p3) target bundleno = 298 (0x12a), region = 28 }
   0xc   : > { %s626_s12 = smov (!%p216_p4, %s539_s12), 1  ;;  %vm257_vm0 = vcmask 1044480   ;;  %v251_v14 = vlaneseq  ;;  %vm315_vm7 = vcmask 1040384   ;;  %v549_v57 = vmov 0.0  }
   0xd   : > { %s487_s16 = smul.u32 12, %s626_s12  ;;  %s221_s22 = scalar_lea.vmem %s617_s0, %s626_s12 }
   0xe   : > { %v289_v21 = vshrl.u32 %v251_v14, 7  ;;  %v250_v23 = vld [vmem:[%s221_s22] sm:$0x1]  ;;  %v252_v49 = vand.u32 127, %v251_v14  ;;  %s478_s23 = sshll.u32 %s626_s12, 3 }
   0xf   : > { %s229_s19 = scalar_lea.vmem %s618_s1, %s487_s16  ;;  %vm311_vm5 = vcmp.ne.s32.totalorder %v250_v23, 255  ;;  %s236_s26 = scalar_lea.vmem %s619_s2, %s478_s23 }
  0x10   : > { %v484_v0 = vld [vmem:[%s229_s19] sm:$0xff]   ;;  %v246_v1 = vld [vmem:[%s229_s19 + $0x8] sm:$0x7]  ;;  %v294_v22 = vsub.s32 0, %v289_v21  ;;  %v290_v24 = vadd.s32 8, %v289_v21  ;;  %v291_v26 = vadd.s32 16, %v289_v21  ;;  %s243_s30 = scalar_lea.vmem %s620_s3, %s478_s23 }
  0x11   : > { %v485_v2 = vunpack.c.l.bf16 %v484_v0  ;;  %v486_v3 = vunpack.c.h.bf16 %v484_v0  ;;  %v249_v4 = vunpack.c.l.bf16 %v246_v1  ;;  %vm256_vm4 = vcmp.lt.s32.totalorder %v252_v49, 64 }
  0x12   : > { %v295_v25 = vrot.slane %v250_v23, %v294_v22  ;;  %vm312_vm6 = vmand %vm311_vm5, %vm256_vm4 }
  0x13   : > { %v258_v5 = vsel %vm257_vm0, %v249_v4, -inf  ;;  %v259_v6 = vmax.f32 %v485_v2, %v486_v3  ;;  %v480_v58 = vsel %vm312_vm6, 1.0, %v549_v57 }
  0x14   : > { %vm296_vm1 = vcmp.eq.s32.totalorder %v289_v21, %v295_v25  ;;  %vm297_vm2 = vcmp.eq.s32.totalorder %v290_v24, %v295_v25  ;;  %vm298_vm3 = vcmp.eq.s32.totalorder %v291_v26, %v295_v25  ;;  %v328_v60 = vsel %vm315_vm7, %v480_v58, 0.0 }
  0x15   : > { %v260_v7 = vmax.f32 %v259_v6, %v258_v5  ;;  %v299_v29 = vsel %vm296_vm1, %v485_v2, 0.0  ;;  %v300_v30 = vsel %vm297_vm2, %v486_v3, 0.0  ;;  %v301_v33 = vsel %vm298_vm3, %v249_v4, 0.0 }
  0x16   : > { %v302_v36 = vadd.f32 %v300_v30, %v299_v29  ;;  %v303_v37 = vsel %vm257_vm0, %v301_v33, 0.0 }
  0x17   : > { %v261_v8 = vrot.slane %v260_v7, 4 }
  0x18   : > { %v304_v40 = vadd.f32 %v303_v37, %v302_v36 }
  0x19   : > { %v262_v9 = vmax.f32 %v260_v7, %v261_v8 }
  0x1a   : > { %v305_v43 = vrot.slane %v304_v40, 4 }
  0x1b   : > { %v263_v10 = vrot.slane %v262_v9, 2 }
  0x1c   : > { %v306_v46 = vadd.f32 %v305_v43, %v304_v40 }
  0x1d   : > { %v264_v11 = vmax.f32 %v262_v9, %v263_v10 }
  0x1e   : > { %v307_v47 = vrot.slane %v306_v46, 2 }
  0x1f   : > { %v265_v12 = vrot.slane %v264_v11, 1 }
  0x20   : > { %v308_v48 = vadd.f32 %v307_v47, %v306_v46 }
  0x21   : > { %v266_v13 = vmax.f32 %v264_v11, %v265_v12 }
  0x22   : > { %v309_v50 = vrot.slane %v308_v48, 1 }
  0x23   : > { %v267_v15 = vsub.f32 %v485_v2, %v266_v13  ;;  %v268_v16 = vsub.f32 %v486_v3, %v266_v13  ;;  %v269_v17 = vsub.f32 %v249_v4, %v266_v13 }
  0x24   : > { %v310_v53 = vadd.f32 %v309_v50, %v308_v48 }
  0x25   : > { %v270_v18 = vmul.f32 1.442695, %v267_v15  ;;  %v272_v19 = vmul.f32 1.442695, %v268_v16  ;;  %v274_v20 = vmul.f32 1.442695, %v269_v17 }
  0x27   : > { %517 = vpow2.f32 %v270_v18 }
  0x28   : > { %519 = vpow2.f32 %v272_v19 }
  0x29   : > { %521 = vpow2.f32 %v274_v20 }
  0x34   : > { %v518_v27 = vpop.eup %517 }
  0x35   : > { %v520_v28 = vpop.eup %519 }
  0x36   : > { %v522_v31 = vpop.eup %521  ;;  %v276_v32 = vadd.f32 %v520_v28, %v518_v27 }
  0x37   : > { %v277_v34 = vsel %vm257_vm0, %v522_v31, 0.0 }
  0x38   : > { %v278_v35 = vadd.f32 %v277_v34, %v276_v32 }
  0x3a   : > { %v279_v38 = vrot.slane %v278_v35, 4 }
  0x3c   : > { %v280_v39 = vadd.f32 %v279_v38, %v278_v35 }
  0x3e   : > { %v281_v41 = vrot.slane %v280_v39, 2 }
  0x40   : > { %v282_v42 = vadd.f32 %v281_v41, %v280_v39 }
  0x42   : > { %v283_v44 = vrot.slane %v282_v42, 1 }
  0x44   : > { %v284_v45 = vadd.f32 %v283_v44, %v282_v42 }
  0x46   : > { %523 = vlog2.f32 %v284_v45 }
  0x53   : > { %v524_v51 = vpop.eup %523 }
  0x54   : > { %v286_v52 = vmul.f32 0.6931472, %v524_v51 }
  0x56   : > { %v287_v54 = vadd.f32 %v286_v52, %v266_v13 }
  0x58   : > { %v313_v55 = vsub.f32 %v287_v54, %v310_v53 }
  0x5a   : > { %v314_v56 = vsel %vm312_vm6, %v313_v55, 0.0 }
  0x5b   : > { %v316_v59 = vsel %vm315_vm7, %v314_v56, 0.0 }
  0x5c   : > { %317 = vadd.xlane.f32.xlu0 %v316_v59 }
  0x60   : > { %329 = vadd.xlane.f32.xlu0 %v328_v60 }
  0xe5   : > { %v318_v61 = vpop.xlane.xlu0 %317 }
  0xe6   : > { %v319_v62 = vrot.slane %v318_v61, 4 }
  0xe8   : > { %v320_v63 = vadd.f32 %v319_v62, %v318_v61 }
  0xe9   : > { %v330_v0 = vpop.xlane.xlu0 %329 }
  0xea   : > { %v321_v1 = vrot.slane %v320_v63, 2  ;;  %v331_v2 = vrot.slane %v330_v0, 4 }
  0xec   : > { %v332_v3 = vadd.f32 %v331_v2, %v330_v0  ;;  %v322_v4 = vadd.f32 %v321_v1, %v320_v63 }
  0xee   : > { %v333_v5 = vrot.slane %v332_v3, 2  ;;  %v323_v6 = vrot.slane %v322_v4, 1 }
  0xf0   : > { %v334_v7 = vadd.f32 %v333_v5, %v332_v3  ;;  %v324_v8 = vadd.f32 %v323_v6, %v322_v4 }
  0xf2   : > { %488 = vpush %v324_v8  ;;  %v335_v9 = vrot.slane %v334_v7, 1 }
  0xf4   : > { %v336_v10 = vadd.f32 %v335_v9, %v334_v7 }
  0xf6   : > { %490 = vpush %v336_v10 }
 0x123   : > { %s489_s27 = spop %488 }
 0x124   : > { %v338_v11 = vstv %s489_s27 }
 0x125   : > { %339 = vst [vmem:[%s236_s26] sm:$0xff] %v338_v11 }
 0x127   : > { %s491_s4 = spop %490 }
 0x128   : > { %v340_v12 = vstv %s491_s4 }
 0x129   : > { %341 = vst [vmem:[%s243_s30] sm:$0xff] %v340_v12 }
 0x12a PF: > { %s14_s14 = sadd.s32 1, %s547_s14   ;;  %s621_s12 = smov %s543_s13 }
 0x12b   : > { %p11_p5 = scmp.ge.s32.totalorder %s14_s14, 4   ;;  %s622_s13 = smov %s624_s15 }
 0x12d   :  { %13 = sbr.rel (!%p11_p5) target bundleno = 2 (0x2), region = 73 }

// kernel: pyramid_loss.7
= control target key start
LH: loop header
LB: loop body
LE: loop exit
PB: predicated region body
PF: predicated region fallthrough
CT: control target
= control target key end

     0   :  { %s715_s12 = smov 0   ;;  %s717_s13 = smov 0   ;;  %s826_s0 = inlined_call_operand.vmem [shape: s32[2,1,256], index: 0, kind: input, shape index: {}]   ;;  %s827_s1 = inlined_call_operand.vmem [shape: bf16[2,21,256], index: 1, kind: input, shape index: {}]   ;;  %s828_s2 = inlined_call_operand.vmem [shape: f32[2,1,8,128], index: 2, kind: output, shape index: {0}]   ;;  %s829_s3 = inlined_call_operand.vmem [shape: f32[2,1,8,128], index: 3, kind: output, shape index: {1}]  }
   0x1   :  { %s719_s14 = smov 0  }
   0x2 LB: > { %s26_s15 = sadd.s32 1, %s685_s13  ;;  %p610_p0 = scmp.ge.s32.totalorder %s689_s14, 1  ;;  %s689_s14 = sphi %s719_s14, %s14_s14   ;;  %s685_s13 = sphi %s717_s13, %s831_s13   ;;  %s681_s12 = sphi %s715_s12, %s830_s12  }
   0x3   : > { %p28_p1 = scmp.ge.s32.totalorder %s26_s15, 2  ;;  %p179_p2 = scmp.lt.s32.totalorder %s689_s14, 3 }
   0x5   : > { %s833_s15 = smov (%p28_p1, %s26_s15), 0  ;;  %p180_p3 = pnand %p610_p0, %p179_p2 }
   0x6   : > { %p225_p4 = scmp.lt.s32.totalorder (!%p180_p3), %s681_s12, 1 }
   0x7   : > { %183 = sbr.rel (%p180_p3) target bundleno = 312 (0x138), region = 28 }
   0xc   : > { %s835_s12 = smov (!%p225_p4, %s681_s12), 1  ;;  %vm276_vm0 = vcmask 1044480   ;;  %v267_v31 = vlaneseq  ;;  %vm431_vm11 = vcmask 1040384  }
   0xd   : > { %s618_s16 = smul.u32 24, %s835_s12  ;;  %s611_s20 = sshll.u32 %s835_s12, 1 }
   0xe   : > { %v772_v40 = vshrl.u32 %v267_v31, 7  ;;  %s231_s23 = scalar_lea.vmem %s826_s0, %s611_s20  ;;  %s613_s24 = sshll.u32 %s835_s12, 3 }
   0xf   : > { %s241_s19 = scalar_lea.vmem %s827_s1, %s618_s16  ;;  %v780_v42 = vld [vmem:[%s231_s23] sm:$0x3]  ;;  %s249_s27 = scalar_lea.vmem %s828_s2, %s613_s24 }
  0x10   : > { %v257_v0 = vld [vmem:[%s241_s19] sm:$0xff]  ;;  %v258_v1 = vld [vmem:[%s241_s19 + $0x8] sm:$0xff]  ;;  %v259_v2 = vld [vmem:[%s241_s19 + $0x10] sm:$0x77]  ;;  %v778_v41 = vsub.s32 0, %v772_v40  ;;  %v783_v43 = vsub.s32 1, %v772_v40  ;;  %s256_s4 = scalar_lea.vmem %s829_s3, %s613_s24 }
  0x11   : > { %v739_v3 = vunpack.c.l.bf16 %v257_v0  ;;  %v741_v4 = vunpack.c.h.bf16 %v257_v0  ;;  %v743_v5 = vunpack.c.l.bf16 %v259_v2  ;;  %v745_v6 = vunpack.c.h.bf16 %v259_v2 }
  0x12   : > { %v262_v7 = vunpack.c.l.bf16 %v258_v1  ;;  %v747_v8 = vunpack.c.h.bf16 %v258_v1  ;;  %v339_v44 = vadd.s32 8, %v772_v40  ;;  %v344_v45 = vrot.slane %v780_v42, %v778_v41 }
  0x13   : > { %v277_v9 = vsel %vm276_vm0, %v743_v5, -inf  ;;  %v286_v10 = vsel %vm276_vm0, %v745_v6, -inf  ;;  %v340_v46 = vadd.s32 16, %v772_v40  ;;  %v348_v47 = vrot.slane %v780_v42, %v783_v43 }
  0x14   : > { %v278_v11 = vmax.f32 %v739_v3, %v277_v9  ;;  %v287_v12 = vmax.f32 %v741_v4, %v286_v10  ;;  %vm349_vm1 = vcmp.eq.s32.totalorder %v772_v40, %v344_v45  ;;  %vm351_vm2 = vcmp.eq.s32.totalorder %v339_v44, %v344_v45 }
  0x15   : > { %vm350_vm3 = vcmp.eq.s32.totalorder %v772_v40, %v348_v47  ;;  %vm352_vm4 = vcmp.eq.s32.totalorder %v339_v44, %v348_v47  ;;  %vm353_vm5 = vcmp.eq.s32.totalorder %v340_v46, %v344_v45  ;;  %vm354_vm6 = vcmp.eq.s32.totalorder %v340_v46, %v348_v47 }
  0x16   : > { %v279_v13 = vmax.f32 %v278_v11, %v262_v7  ;;  %v288_v14 = vmax.f32 %v287_v12, %v747_v8  ;;  %v355_v53 = vsel %vm349_vm1, %v739_v3, 0.0  ;;  %v357_v54 = vsel %vm351_vm2, %v262_v7, 0.0 }
  0x17   : > { %v356_v57 = vsel %vm350_vm3, %v741_v4, 0.0  ;;  %v358_v58 = vsel %vm352_vm4, %v747_v8, 0.0  ;;  %v359_v59 = vsel %vm353_vm5, %v743_v5, 0.0  ;;  %v360_v62 = vsel %vm354_vm6, %v745_v6, 0.0 }
  0x18   : > { %v280_v15 = vrot.slane %v279_v13, 4  ;;  %v289_v16 = vrot.slane %v288_v14, 4  ;;  %v361_v1 = vadd.f32 %v357_v54, %v355_v53  ;;  %vm379_vm8 = vcmp.ne.s32.totalorder %v780_v42, 255 }
  0x1a   : > { %v281_v17 = vmax.f32 %v279_v13, %v280_v15  ;;  %v290_v18 = vmax.f32 %v288_v14, %v289_v16  ;;  %v268_v14 = vand.u32 127, %v267_v31 }
  0x1c   : > { %v282_v19 = vrot.slane %v281_v17, 2  ;;  %v291_v20 = vrot.slane %v290_v18, 2 }
  0x1e   : > { %v283_v21 = vmax.f32 %v281_v17, %v282_v19  ;;  %v292_v22 = vmax.f32 %v290_v18, %v291_v20  ;;  %v269_v20 = vadd.s32 128, %v268_v14 }
  0x20   : > { %v284_v23 = vrot.slane %v283_v21, 1  ;;  %v293_v24 = vrot.slane %v292_v22, 1  ;;  %vm275_vm7 = vcmp.lt.s32.totalorder %v269_v20, 144 }
  0x22   : > { %v756_v25 = vmax.f32 %v283_v21, %v284_v23  ;;  %v758_v26 = vmax.f32 %v292_v22, %v293_v24 }
  0x24   : > { %v295_v27 = vsub.f32 %v739_v3, %v756_v25  ;;  %v296_v28 = vsub.f32 %v741_v4, %v758_v26  ;;  %v297_v29 = vsub.f32 %v262_v7, %v756_v25  ;;  %v298_v30 = vsub.f32 %v747_v8, %v758_v26 }
  0x25   : > { %v299_v32 = vsub.f32 %v743_v5, %v756_v25  ;;  %v300_v33 = vsub.f32 %v745_v6, %v758_v26  ;;  %v362_v3 = vsel %vm276_vm0, %v359_v59, 0.0  ;;  %v370_v7 = vadd.f32 %v358_v58, %v356_v57 }
  0x26   : > { %v301_v34 = vmul.f32 1.442695, %v295_v27  ;;  %v303_v35 = vmul.f32 1.442695, %v296_v28  ;;  %v305_v36 = vmul.f32 1.442695, %v297_v29  ;;  %v363_v11 = vadd.f32 %v362_v3, %v361_v1 }
  0x27   : > { %v307_v37 = vmul.f32 1.442695, %v298_v30  ;;  %v309_v38 = vmul.f32 1.442695, %v299_v32  ;;  %v311_v39 = vmul.f32 1.442695, %v300_v33 }
  0x28   : > { %651 = vpow2.f32 %v301_v34  ;;  %v371_v4 = vsel %vm276_vm0, %v360_v62, 0.0  ;;  %v364_v16 = vrot.slane %v363_v11, 4  ;;  %v691_v28 = vmov 1966171168  }
  0x29   : > { %653 = vpow2.f32 %v303_v35  ;;  %v372_v12 = vadd.f32 %v371_v4, %v370_v7  ;;  %v384_v29 = vunpack.c.l.s4 %v691_v28  ;;  %v692_v33 = vmov 0  }
  0x2a   : > { %655 = vpow2.f32 %v305_v36  ;;  %v365_v23 = vadd.f32 %v364_v16, %v363_v11  ;;  %v381_v34 = vsel %vm275_vm7, 1, %v692_v33  ;;  %v694_v59 = vmov 0.0  }
  0x2b   : > { %657 = vpow2.f32 %v307_v37  ;;  %v373_v18 = vrot.slane %v372_v12, 4  ;;  %v385_v31 = vunpack.c.0.s8 %v384_v29  ;;  %v693_v37 = vmov 1  }
  0x2c   : > { %659 = vpow2.f32 %v309_v38  ;;  %v366_v30 = vrot.slane %v365_v23, 2  ;;  %v382_v38 = vcombine.low %v693_v37, %v381_v34 }
  0x2d   : > { %661 = vpow2.f32 %v311_v39  ;;  %v374_v27 = vadd.f32 %v373_v18, %v372_v12  ;;  %v388_v39 = vsub.s32 %v385_v31, %v772_v40 }
  0x2e   : > { %v367_v35 = vadd.f32 %v366_v30, %v365_v23 }
  0x2f   : > { %v375_v32 = vrot.slane %v374_v27, 2  ;;  %v389_v46 = vrot.slane %v382_v38, %v388_v39 }
  0x30   : > { %v368_v44 = vrot.slane %v367_v35, 1 }
  0x31   : > { %v376_v36 = vadd.f32 %v375_v32, %v374_v27  ;;  %v396_v53 = vrot.slane %v389_v46, %v388_v39 }
  0x33   : > { %v377_v45 = vrot.slane %v376_v36, 1  ;;  %vm397_vm9 = vcmp.ne.s32.totalorder %v396_v53, 0 }
  0x34   : > { %vm398_vm10 = vmand %vm379_vm8, %vm397_vm9 }
  0x35   : > { %v652_v48 = vpop.eup %651 }
  0x36   : > { %v654_v49 = vpop.eup %653 }
  0x37   : > { %v656_v50 = vpop.eup %655 }
  0x38   : > { %v658_v51 = vpop.eup %657  ;;  %v313_v52 = vadd.f32 %v656_v50, %v652_v48  ;;  %v369_v50 = vadd.f32 %v368_v44, %v367_v35 }
  0x39   : > { %v660_v55 = vpop.eup %659  ;;  %v322_v56 = vadd.f32 %v658_v51, %v654_v49 }
  0x3a   : > { %v662_v60 = vpop.eup %661  ;;  %v314_v61 = vsel %vm276_vm0, %v660_v55, 0.0 }
  0x3b   : > { %v315_v63 = vadd.f32 %v314_v61, %v313_v52  ;;  %v323_v0 = vsel %vm276_vm0, %v662_v60, 0.0  ;;  %v378_v52 = vadd.f32 %v377_v45, %v376_v36  ;;  %v615_v60 = vsel %vm398_vm10, 1.0, %v694_v59 }
  0x3c   : > { %v324_v2 = vadd.f32 %v323_v0, %v322_v56  ;;  %v450_v62 = vrot.slane %v615_v60, %v778_v41 }
  0x3d   : > { %v316_v9 = vrot.slane %v315_v63, 4 }
  0x3e   : > { %v325_v10 = vrot.slane %v324_v2, 4 }
  0x3f   : > { %v317_v8 = vadd.f32 %v316_v9, %v315_v63  ;;  %v454_v63 = vrot.slane %v615_v60, %v783_v43 }
  0x40   : > { %v326_v5 = vadd.f32 %v325_v10, %v324_v2  ;;  %v457_v2 = vsel %vm431_vm11, %v450_v62, 0.0 }
  0x41   : > { %v318_v13 = vrot.slane %v317_v8, 2  ;;  %v458_v3 = vsel %vm431_vm11, %v454_v63, 0.0 }
  0x42   : > { %v327_v15 = vrot.slane %v326_v5, 2  ;;  %v459_v9 = vadd.f32 %v458_v3, %v457_v2 }
  0x43   : > { %v319_v6 = vadd.f32 %v318_v13, %v317_v8 }
  0x44   : > { %v328_v17 = vadd.f32 %v327_v15, %v326_v5 }
  0x45   : > { %v320_v19 = vrot.slane %v319_v6, 1 }
  0x46   : > { %v329_v21 = vrot.slane %v328_v17, 1 }
  0x47   : > { %v321_v22 = vadd.f32 %v320_v19, %v319_v6 }
  0x48   : > { %v330_v24 = vadd.f32 %v329_v21, %v328_v17 }
  0x49   : > { %663 = vlog2.f32 %v321_v22 }
  0x4a   : > { %665 = vlog2.f32 %v330_v24 }
  0x56   : > { %v664_v47 = vpop.eup %663 }
  0x57   : > { %v666_v48 = vpop.eup %665  ;;  %v332_v49 = vmul.f32 0.6931472, %v664_v47 }
  0x58   : > { %v334_v51 = vmul.f32 0.6931472, %v666_v48 }
  0x59   : > { %v335_v54 = vadd.f32 %v332_v49, %v756_v25 }
  0x5a   : > { %v336_v55 = vadd.f32 %v334_v51, %v758_v26 }
  0x5b   : > { %v399_v56 = vsub.f32 %v335_v54, %v369_v50 }
  0x5c   : > { %v400_v57 = vsub.f32 %v336_v55, %v378_v52 }
  0x5e   : > { %v403_v40 = vcombine.low %v399_v56, %v400_v57 }
  0x60   : > { %v410_v58 = vrot.slane %v403_v40, %v388_v39 }
  0x62   : > { %v417_v61 = vrot.slane %v410_v58, %v388_v39 }
  0x64   : > { %v419_v0 = vsel %vm398_vm10, %v417_v61, 0.0 }
  0x65   : > { %v424_v25 = vrot.slane %v419_v0, %v778_v41  ;;  %v428_v26 = vrot.slane %v419_v0, %v783_v43 }
  0x67   : > { %v432_v1 = vsel %vm431_vm11, %v424_v25, 0.0  ;;  %v433_v42 = vsel %vm431_vm11, %v428_v26, 0.0 }
  0x68   : > { %v434_v7 = vadd.f32 %v433_v42, %v432_v1 }
  0x6a   : > { %435 = vadd.xlane.f32.xlu0 %v434_v7 }
  0x6e   : > { %460 = vadd.xlane.f32.xlu0 %v459_v9 }
  0xf3   : > { %v436_v4 = vpop.xlane.xlu0 %435 }
  0xf4   : > { %v437_v10 = vrot.slane %v436_v4, 4 }
  0xf6   : > { %v438_v8 = vadd.f32 %v437_v10, %v436_v4 }
  0xf7   : > { %v461_v11 = vpop.xlane.xlu0 %460 }
  0xf8   : > { %v439_v5 = vrot.slane %v438_v8, 2  ;;  %v462_v12 = vrot.slane %v461_v11, 4 }
  0xfa   : > { %v463_v13 = vadd.f32 %v462_v12, %v461_v11  ;;  %v440_v14 = vadd.f32 %v439_v5, %v438_v8 }
  0xfc   : > { %v464_v41 = vrot.slane %v463_v13, 2  ;;  %v441_v15 = vrot.slane %v440_v14, 1 }
  0xfe   : > { %v465_v43 = vadd.f32 %v464_v41, %v463_v13  ;;  %v442_v6 = vadd.f32 %v441_v15, %v440_v14 }
 0x100   : > { %619 = vpush %v442_v6  ;;  %v466_v16 = vrot.slane %v465_v43, 1 }
 0x102   : > { %v467_v17 = vadd.f32 %v466_v16, %v465_v43 }
 0x104   : > { %621 = vpush %v467_v17 }
 0x131   : > { %s620_s28 = spop %619 }
 0x132   : > { %v469_v18 = vstv %s620_s28 }
 0x133   : > { %470 = vst [vmem:[%s249_s27] sm:$0xff] %v469_v18 }
 0x135   : > { %s622_s5 = spop %621 }
 0x136   : > { %v471_v19 = vstv %s622_s5 }
 0x137   : > { %472 = vst [vmem:[%s256_s4] sm:$0xff] %v471_v19 }
 0x138 PF: > { %s14_s14 = sadd.s32 1, %s689_s14   ;;  %s830_s12 = smov %s685_s13 }
 0x139   : > { %p11_p5 = scmp.ge.s32.totalorder %s14_s14, 4   ;;  %s831_s13 = smov %s833_s15 }
 0x13b   :  { %13 = sbr.rel (!%p11_p5) target bundleno = 2 (0x2), region = 73 }

</bundles_post_ra>
